<compile_context>
chip_gen: v5e
topology: v5e:2x2
jax: 0.10.0
libtpu: 0.0.40
codegen_flags: <defaults>
</compile_context>

<pallas_src>
import jax
import jax.numpy as jnp
from jax.experimental import pallas as pl
from jax.experimental.pallas import tpu as pltpu

NEG = -1e9  # finite "-inf" sentinel: keeps exp/log NaN-free for padded tags/steps/columns


def _round_up(x, m):
    return ((x + m - 1) // m) * m


def _crf_denom_kernel(em_ref, mask_ref, expt_ref, cmax_ref, end_ref, out_ref, norm_ref):
    """Forward-algorithm (log partition function) for one (batch_tile, seq_chunk)."""
    sc = pl.program_id(1)
    s_chunk = em_ref.shape[0]
    T, TB = norm_ref.shape

    expt = expt_ref[...]            # (T, T): expt[j, i] = exp(trans[i, j] - cmax[j])
    cmax = cmax_ref[...]            # (T, 1): per-destination-tag column max of trans

    # First global timestep: alpha_0 = start + emissions[0] (start folded in the wrapper).
    @pl.when(sc == 0)
    def _():
        norm_ref[...] = em_ref[0]

    def step(r, carry):
        em = em_ref[r]                                   # (T, TB) emissions at this step
        m_on = mask_ref[r] > 0.5                         # (1, TB); mask[0] zeroed in wrapper
        norm = norm_ref[...]                             # (T, TB)
        mx = jnp.max(norm, axis=0, keepdims=True)        # (1, TB)
        p = jnp.exp(norm - mx)                           # (T, TB)   EUP

        # ssum[j, b] = sum_i exp(trans[i, j] - cmax[j]) * p[i, b]
        # Exact-f32 VPU FMA accumulation over i: a few live vregs, no (T,T,TB) temp.
        # TODO(synk): for large tag counts switch this to an MXU jnp.dot.
        ssum = expt[:, 0:1] * p[0:1, :]
        for i in range(1, T):
            ssum = ssum + expt[:, i:i + 1] * p[i:i + 1, :]

        nxt = em + mx + cmax + jnp.log(ssum)             # (T, TB)
        norm_ref[...] = jnp.where(m_on, nxt, norm)
        return carry

    jax.lax.fori_loop(0, s_chunk, step, 0, unroll=True)

    # Last chunk: add end transitions and reduce to the log partition function.
    @pl.when(sc == pl.num_programs(1) - 1)
    def _():
        normf = norm_ref[...] + end_ref[...]             # (T, TB)
        mx = jnp.max(normf, axis=0, keepdims=True)
        out_ref[...] = mx + jnp.log(jnp.sum(jnp.exp(normf - mx), axis=0, keepdims=True))


def _pick_tiles(S, T_pad, B_pad):
    # Batch tile: lane-dense (multiple of 128). Prefer >= 2 tiles when the padded batch
    # allows it so the "parallel" grid axis can shard across v7x's two TensorCores;
    # otherwise one big tile (fewer grid steps on single-TC v5e/v6e).
    tb = min(B_pad, 512)
    for cand in (512, 256, 128):
        if B_pad % cand == 0 and B_pad // cand >= 2:
            tb = cand
            break

    # Sequence chunk from {32, 16, 8}: minimize padding, ties broken by larger chunk.
    s_chunk = min((32, 16, 8), key=lambda c: (_round_up(S, c), -c))

    def vmem_est(sc, tb_):
        return 4 * (2 * sc * T_pad * tb_       # emissions, double-buffered
                    + 2 * sc * 8 * tb_         # mask, sublane-padded, double-buffered
                    + 2 * T_pad * T_pad        # exp(trans - cmax)
                    + 4 * T_pad * 128          # cmax / end, lane-padded
                    + T_pad * tb_              # norm scratch
                    + 6 * T_pad * tb_          # live per-step temporaries
                    + 2 * 8 * tb_)             # output tile

    budget = 20 << 20                          # headroom under v7x's 64 MiB VMEM
    while vmem_est(s_chunk, tb) > budget and s_chunk > 8:
        s_chunk = max(8, s_chunk // 2)
    while vmem_est(s_chunk, tb) > budget and tb > 128:
        tb //= 2
    return s_chunk, tb, vmem_est(s_chunk, tb)


def crf_forward(emissions, tags, mask, start, end, trans, reduction="mean"):
    """CRF.forward (batch_first=False). emissions (S,B,T), tags (S,B), mask (S,B)."""
    S, B, T = emissions.shape
    emissions = emissions.astype(jnp.float32)
    tags_i = tags.astype(jnp.int32)
    mask_i = mask.astype(jnp.int32)
    maskf = mask_i.astype(jnp.float32)
    start = start.astype(jnp.float32)
    end = end.astype(jnp.float32)
    trans = trans.astype(jnp.float32)

    # ---- gold-path numerator: O(S*B) gathers done in plain XLA (hoisted out of kernel) ----
    ar = jnp.arange(B)
    em_tag = jnp.take_along_axis(emissions, tags_i[:, :, None], axis=2)[..., 0]   # (S, B)
    num = start[tags_i[0]] + em_tag[0]
    if S > 1:
        tr_sc = trans[tags_i[:-1], tags_i[1:]]                                    # (S-1, B)
        num = num + jnp.sum((tr_sc + em_tag[1:]) * maskf[1:], axis=0)
    seq_ends = jnp.sum(mask_i, axis=0) - 1
    last_tags = tags_i[seq_ends, ar]
    num = num + end[last_tags]

    # ---- denominator (log partition function): Pallas kernel ----
    T_pad = _round_up(max(T, 8), 8)
    B_pad = _round_up(max(B, 128), 128)
    S_CHUNK, TB, vmem_need = _pick_tiles(S, T_pad, B_pad)
    S_pad = _round_up(S, S_CHUNK)

    # emissions -> (S, T, B) lane-dense, start folded into step 0, pad with NEG sentinel
    em_t = jnp.transpose(emissions, (0, 2, 1))                 # (S, T, B)
    em_t = em_t.at[0].add(start[:, None])
    em_p = jnp.pad(em_t, ((0, S_pad - S), (0, T_pad - T), (0, B_pad - B)),
                   constant_values=NEG)

    # mask copy for the kernel: step 0 handled by the init branch; padded steps/cols = 0
    mask_k = maskf.at[0].set(0.0)
    mask_k = jnp.pad(mask_k, ((0, S_pad - S), (0, B_pad - B)))
    mask3 = mask_k[:, None, :]                                 # (S_pad, 1, B_pad)

    # transitions: column-max offset + exp precomputed once (keeps constrained CRFs finite)
    trans_p = jnp.pad(trans, ((0, T_pad - T), (0, T_pad - T)), constant_values=NEG)
    cmax = jnp.max(trans_p, axis=0)                            # (T_pad,)
    expt = jnp.exp(trans_p - cmax[None, :]).T                  # (T_pad, T_pad): [j, i]
    cmax2 = cmax.reshape(T_pad, 1)
    end_p = jnp.pad(end, (0, T_pad - T), constant_values=NEG).reshape(T_pad, 1)

    n_bt = B_pad // TB
    n_sc = S_pad // S_CHUNK

    cparams = pltpu.CompilerParams(
        dimension_semantics=("parallel", "arbitrary"),
        vmem_limit_bytes=int(min(max(2 * vmem_need, 4 << 20), 64 << 20)),
    )
    cost = pl.CostEstimate(
        flops=int(2 * S_pad * B_pad * T_pad * T_pad + 8 * S_pad * B_pad * T_pad),
        transcendentals=int(2 * S_pad * B_pad * T_pad),
        bytes_accessed=int(4 * (S_pad * T_pad * B_pad + S_pad * B_pad
                                + T_pad * T_pad + 3 * B_pad)),
    )

    denom2 = pl.pallas_call(
        _crf_denom_kernel,
        out_shape=jax.ShapeDtypeStruct((1, B_pad), jnp.float32),
        grid_spec=pltpu.PrefetchScalarGridSpec(
            num_scalar_prefetch=0,
            grid=(n_bt, n_sc),
            in_specs=[
                pl.BlockSpec((S_CHUNK, T_pad, TB), lambda bt, sc: (sc, 0, bt)),  # emissions
                pl.BlockSpec((S_CHUNK, 1, TB), lambda bt, sc: (sc, 0, bt)),      # mask
                pl.BlockSpec((T_pad, T_pad), lambda bt, sc: (0, 0)),             # exp(trans)
                pl.BlockSpec((T_pad, 1), lambda bt, sc: (0, 0)),                 # colmax
                pl.BlockSpec((T_pad, 1), lambda bt, sc: (0, 0)),                 # end
            ],
            out_specs=pl.BlockSpec((1, TB), lambda bt, sc: (0, bt)),
            scratch_shapes=[pltpu.VMEM((T_pad, TB), jnp.float32)],               # norm
        ),
        compiler_params=cparams,
        cost_estimate=cost,
    )(em_p, mask3, expt, cmax2, end_p)

    denom = denom2[0, :B]
    llh = num - denom
    if reduction == "none":
        return llh
    if reduction == "sum":
        return llh.sum()
    if reduction == "mean":
        return llh.mean()
    return llh.sum() / maskf.sum()   # token_mean


def crf_forward_ref(emissions, tags, mask, start, end, trans):
    """Pure-JAX reference matching the PyTorch CRF (reduction='none')."""
    S, B, T = emissions.shape
    maskf = mask.astype(jnp.float32)
    ar = jnp.arange(B)
    score = start[tags[0]] + emissions[0, ar, tags[0]]
    for i in range(1, S):
        score = score + trans[tags[i - 1], tags[i]] * maskf[i]
        score = score + emissions[i, ar, tags[i]] * maskf[i]
    seq_ends = mask.astype(jnp.int32).sum(0) - 1
    last_tags = tags[seq_ends, ar]
    score = score + end[last_tags]

    ns = start[None, :] + emissions[0]
    for i in range(1, S):
        nxt = jax.scipy.special.logsumexp(
            ns[:, :, None] + trans[None, :, :] + emissions[i][:, None, :], axis=1)
        ns = jnp.where(maskf[i][:, None] > 0.5, nxt, ns)
    denom = jax.scipy.special.logsumexp(ns + end[None, :], axis=1)
    return score - denom


if __name__ == "__main__":
    S, B, T = 8, 8, 8   # seq_length, batch, num_tags

    key = jax.random.PRNGKey(0)
    k_em, k_tag, k_s, k_e, k_t = jax.random.split(key, 5)

    # uniform(-0.1, 0.1) parameter init, matching reset_parameters()
    start_transitions = jax.random.uniform(k_s, (T,), jnp.float32, -0.1, 0.1)
    end_transitions = jax.random.uniform(k_e, (T,), jnp.float32, -0.1, 0.1)
    transitions = jax.random.uniform(k_t, (T, T), jnp.float32, -0.1, 0.1)

    emissions = jax.random.normal(k_em, (S, B, T), jnp.float32)
    tags = jax.random.randint(k_tag, (S, B), 0, T, jnp.int32)
    # variable-length prefix mask; first timestep all on (required by the module)
    lengths = jnp.array([8, 6, 5, 7, 8, 4, 3, 2], jnp.int32)
    mask = (jnp.arange(S)[:, None] < lengths[None, :]).astype(jnp.uint8)

    llh_none = crf_forward(emissions, tags, mask, start_transitions, end_transitions,
                           transitions, reduction="none")
    llh_mean = crf_forward(emissions, tags, mask, start_transitions, end_transitions,
                           transitions, reduction="mean")
    jax.block_until_ready(llh_none)
    jax.block_until_ready(llh_mean)

    ref = crf_forward_ref(emissions, tags, mask, start_transitions, end_transitions,
                          transitions)
    assert jnp.allclose(llh_none, ref, rtol=1e-4, atol=1e-4), (llh_none, ref)
    assert jnp.allclose(llh_mean, ref.mean(), rtol=1e-4, atol=1e-4)

    print("KERNEL_OK")
</pallas_src>

<mosaic_0001>
module attributes {stable_mosaic.version = 11 : i64} {
  func.func @_crf_denom_kernel(%arg0: i32, %arg1: i32, %arg2: memref<8x8x128xf32, #tpu.memory_space<vmem>>, %arg3: memref<8x1x128xf32, #tpu.memory_space<vmem>>, %arg4: memref<8x8xf32, #tpu.memory_space<vmem>>, %arg5: memref<8x1xf32, #tpu.memory_space<vmem>>, %arg6: memref<8x1xf32, #tpu.memory_space<vmem>>, %arg7: memref<1x128xf32, #tpu.memory_space<vmem>>, %arg8: memref<8x128xf32, #tpu.memory_space<vmem>>) attributes {dimension_semantics = [#tpu.dimension_semantics<parallel>, #tpu.dimension_semantics<arbitrary>], iteration_bounds = array<i64: 1, 1>, scalar_prefetch = 0 : i64, scratch_operands = 1 : i64, tpu.core_type = #tpu.core_type<tc>, window_params = [{transform_indices = @transform_0, window_bounds = array<i64: 8, 8, 128>}, {transform_indices = @transform_1, window_bounds = array<i64: 8, 1, 128>}, {pipeline_mode = #tpu.pipeline_mode<synchronous>, transform_indices = @transform_2, window_bounds = array<i64: 8, 8>}, {pipeline_mode = #tpu.pipeline_mode<synchronous>, transform_indices = @transform_3, window_bounds = array<i64: 8, 1>}, {pipeline_mode = #tpu.pipeline_mode<synchronous>, transform_indices = @transform_4, window_bounds = array<i64: 8, 1>}, {transform_indices = @transform_5, window_bounds = array<i64: 1, 128>}]} {
    %c0 = arith.constant 0 : index
    %c0_0 = arith.constant 0 : index
    %0 = vector.load %arg4[%c0, %c0_0] : memref<8x8xf32, #tpu.memory_space<vmem>>, vector<8x8xf32>
    %c0_1 = arith.constant 0 : index
    %c0_2 = arith.constant 0 : index
    %1 = vector.load %arg5[%c0_1, %c0_2] : memref<8x1xf32, #tpu.memory_space<vmem>>, vector<8x1xf32>
    %c0_i32 = arith.constant 0 : i32
    %2 = arith.cmpi eq, %arg1, %c0_i32 : i32
    %3 = arith.extui %2 : i1 to i32
    %c0_i32_3 = arith.constant 0 : i32
    %4 = arith.cmpi ne, %3, %c0_i32_3 : i32
    scf.if %4 {
      %c0_86 = arith.constant 0 : index
      %c0_87 = arith.constant 0 : index
      %c0_88 = arith.constant 0 : index
      %576 = vector.load %arg2[%c0_86, %c0_87, %c0_88] : memref<8x8x128xf32, #tpu.memory_space<vmem>>, vector<1x8x128xf32>
      %577 = vector.shape_cast %576 : vector<1x8x128xf32> to vector<8x128xf32>
      %c0_89 = arith.constant 0 : index
      %c0_90 = arith.constant 0 : index
      %578 = vector.load %arg8[%c0_89, %c0_90] : memref<8x128xf32, #tpu.memory_space<vmem>>, vector<8x128xf32>
      tpu.vector_store %arg8[%c0_89, %c0_90], %577 {strides = array<i32>} : memref<8x128xf32, #tpu.memory_space<vmem>>, vector<8x128xf32>,
    } else {
    }
    %c0_i32_4 = arith.constant 0 : i32
    %5 = arith.index_cast %c0_i32_4 : i32 to index
    %c0_5 = arith.constant 0 : index
    %c0_6 = arith.constant 0 : index
    %6 = vector.load %arg2[%5, %c0_5, %c0_6] : memref<8x8x128xf32, #tpu.memory_space<vmem>>, vector<1x8x128xf32>
    %7 = vector.shape_cast %6 : vector<1x8x128xf32> to vector<8x128xf32>
    %8 = arith.index_cast %c0_i32_4 : i32 to index
    %c0_7 = arith.constant 0 : index
    %c0_8 = arith.constant 0 : index
    %9 = vector.load %arg3[%8, %c0_7, %c0_8] : memref<8x1x128xf32, #tpu.memory_space<vmem>>, vector<1x1x128xf32>
    %10 = vector.shape_cast %9 : vector<1x1x128xf32> to vector<1x128xf32>
    %cst = arith.constant 5.000000e-01 : f32
    %11 = vector.broadcast %cst : f32 to vector<1x128xf32>
    %12 = arith.cmpf ogt, %10, %11 : vector<1x128xf32>
    %c0_9 = arith.constant 0 : index
    %c0_10 = arith.constant 0 : index
    %13 = vector.load %arg8[%c0_9, %c0_10] : memref<8x128xf32, #tpu.memory_space<vmem>>, vector<8x128xf32>
    %cst_11 = arith.constant dense<0xFF800000> : vector<128xf32>
    %14 = vector.multi_reduction <maximumf>, %13, %cst_11 [0] : vector<8x128xf32> to vector<128xf32>
    %15 = vector.shape_cast %14 : vector<128xf32> to vector<1x128xf32>
    %16 = vector.broadcast %15 : vector<1x128xf32> to vector<8x128xf32>
    %17 = arith.subf %13, %16 : vector<8x128xf32>
    %18 = math.exp %17 : vector<8x128xf32>
    %19 = vector.extract_strided_slice %0 {offsets = [0, 0], sizes = [8, 1], strides = [1, 1]} : vector<8x8xf32> to vector<8x1xf32>
    %20 = vector.extract_strided_slice %18 {offsets = [0, 0], sizes = [1, 128], strides = [1, 1]} : vector<8x128xf32> to vector<1x128xf32>
    %21 = vector.broadcast %19 : vector<8x1xf32> to vector<8x128xf32>
    %22 = vector.broadcast %20 : vector<1x128xf32> to vector<8x128xf32>
    %23 = arith.mulf %21, %22 : vector<8x128xf32>
    %24 = vector.extract_strided_slice %0 {offsets = [0, 1], sizes = [8, 1], strides = [1, 1]} : vector<8x8xf32> to vector<8x1xf32>
    %25 = vector.extract_strided_slice %18 {offsets = [1, 0], sizes = [1, 128], strides = [1, 1]} : vector<8x128xf32> to vector<1x128xf32>
    %26 = vector.broadcast %24 : vector<8x1xf32> to vector<8x128xf32>
    %27 = vector.broadcast %25 : vector<1x128xf32> to vector<8x128xf32>
    %28 = arith.mulf %26, %27 : vector<8x128xf32>
    %29 = arith.addf %23, %28 : vector<8x128xf32>
    %30 = vector.extract_strided_slice %0 {offsets = [0, 2], sizes = [8, 1], strides = [1, 1]} : vector<8x8xf32> to vector<8x1xf32>
    %31 = vector.extract_strided_slice %18 {offsets = [2, 0], sizes = [1, 128], strides = [1, 1]} : vector<8x128xf32> to vector<1x128xf32>
    %32 = vector.broadcast %30 : vector<8x1xf32> to vector<8x128xf32>
    %33 = vector.broadcast %31 : vector<1x128xf32> to vector<8x128xf32>
    %34 = arith.mulf %32, %33 : vector<8x128xf32>
    %35 = arith.addf %29, %34 : vector<8x128xf32>
    %36 = vector.extract_strided_slice %0 {offsets = [0, 3], sizes = [8, 1], strides = [1, 1]} : vector<8x8xf32> to vector<8x1xf32>
    %37 = vector.extract_strided_slice %18 {offsets = [3, 0], sizes = [1, 128], strides = [1, 1]} : vector<8x128xf32> to vector<1x128xf32>
    %38 = vector.broadcast %36 : vector<8x1xf32> to vector<8x128xf32>
    %39 = vector.broadcast %37 : vector<1x128xf32> to vector<8x128xf32>
    %40 = arith.mulf %38, %39 : vector<8x128xf32>
    %41 = arith.addf %35, %40 : vector<8x128xf32>
    %42 = vector.extract_strided_slice %0 {offsets = [0, 4], sizes = [8, 1], strides = [1, 1]} : vector<8x8xf32> to vector<8x1xf32>
    %43 = vector.extract_strided_slice %18 {offsets = [4, 0], sizes = [1, 128], strides = [1, 1]} : vector<8x128xf32> to vector<1x128xf32>
    %44 = vector.broadcast %42 : vector<8x1xf32> to vector<8x128xf32>
    %45 = vector.broadcast %43 : vector<1x128xf32> to vector<8x128xf32>
    %46 = arith.mulf %44, %45 : vector<8x128xf32>
    %47 = arith.addf %41, %46 : vector<8x128xf32>
    %48 = vector.extract_strided_slice %0 {offsets = [0, 5], sizes = [8, 1], strides = [1, 1]} : vector<8x8xf32> to vector<8x1xf32>
    %49 = vector.extract_strided_slice %18 {offsets = [5, 0], sizes = [1, 128], strides = [1, 1]} : vector<8x128xf32> to vector<1x128xf32>
    %50 = vector.broadcast %48 : vector<8x1xf32> to vector<8x128xf32>
    %51 = vector.broadcast %49 : vector<1x128xf32> to vector<8x128xf32>
    %52 = arith.mulf %50, %51 : vector<8x128xf32>
    %53 = arith.addf %47, %52 : vector<8x128xf32>
    %54 = vector.extract_strided_slice %0 {offsets = [0, 6], sizes = [8, 1], strides = [1, 1]} : vector<8x8xf32> to vector<8x1xf32>
    %55 = vector.extract_strided_slice %18 {offsets = [6, 0], sizes = [1, 128], strides = [1, 1]} : vector<8x128xf32> to vector<1x128xf32>
    %56 = vector.broadcast %54 : vector<8x1xf32> to vector<8x128xf32>
    %57 = vector.broadcast %55 : vector<1x128xf32> to vector<8x128xf32>
    %58 = arith.mulf %56, %57 : vector<8x128xf32>
    %59 = arith.addf %53, %58 : vector<8x128xf32>
    %60 = vector.extract_strided_slice %0 {offsets = [0, 7], sizes = [8, 1], strides = [1, 1]} : vector<8x8xf32> to vector<8x1xf32>
    %61 = vector.extract_strided_slice %18 {offsets = [7, 0], sizes = [1, 128], strides = [1, 1]} : vector<8x128xf32> to vector<1x128xf32>
    %62 = vector.broadcast %60 : vector<8x1xf32> to vector<8x128xf32>
    %63 = vector.broadcast %61 : vector<1x128xf32> to vector<8x128xf32>
    %64 = arith.mulf %62, %63 : vector<8x128xf32>
    %65 = arith.addf %59, %64 : vector<8x128xf32>
    %66 = vector.broadcast %15 : vector<1x128xf32> to vector<8x128xf32>
    %67 = arith.addf %7, %66 : vector<8x128xf32>
    %68 = vector.broadcast %1 : vector<8x1xf32> to vector<8x128xf32>
    %69 = arith.addf %67, %68 : vector<8x128xf32>
    %70 = math.log %65 : vector<8x128xf32>
    %71 = arith.addf %69, %70 : vector<8x128xf32>
    %72 = vector.shape_cast %12 : vector<1x128xi1> to vector<1x128xi1>
    %73 = vector.broadcast %72 : vector<1x128xi1> to vector<8x128xi1>
    %74 = arith.select %73, %71, %13 : vector<8x128xi1>, vector<8x128xf32>
    %c0_12 = arith.constant 0 : index
    %c0_13 = arith.constant 0 : index
    %75 = vector.load %arg8[%c0_12, %c0_13] : memref<8x128xf32, #tpu.memory_space<vmem>>, vector<8x128xf32>
    tpu.vector_store %arg8[%c0_12, %c0_13], %74 {strides = array<i32>} : memref<8x128xf32, #tpu.memory_space<vmem>>, vector<8x128xf32>,
    %c1_i32 = arith.constant 1 : i32
    %76 = arith.index_cast %c1_i32 : i32 to index
    %c0_14 = arith.constant 0 : index
    %c0_15 = arith.constant 0 : index
    %77 = vector.load %arg2[%76, %c0_14, %c0_15] : memref<8x8x128xf32, #tpu.memory_space<vmem>>, vector<1x8x128xf32>
    %78 = vector.shape_cast %77 : vector<1x8x128xf32> to vector<8x128xf32>
    %79 = arith.index_cast %c1_i32 : i32 to index
    %c0_16 = arith.constant 0 : index
    %c0_17 = arith.constant 0 : index
    %80 = vector.load %arg3[%79, %c0_16, %c0_17] : memref<8x1x128xf32, #tpu.memory_space<vmem>>, vector<1x1x128xf32>
    %81 = vector.shape_cast %80 : vector<1x1x128xf32> to vector<1x128xf32>
    %cst_18 = arith.constant 5.000000e-01 : f32
    %82 = vector.broadcast %cst_18 : f32 to vector<1x128xf32>
    %83 = arith.cmpf ogt, %81, %82 : vector<1x128xf32>
    %c0_19 = arith.constant 0 : index
    %c0_20 = arith.constant 0 : index
    %84 = vector.load %arg8[%c0_19, %c0_20] : memref<8x128xf32, #tpu.memory_space<vmem>>, vector<8x128xf32>
    %cst_21 = arith.constant dense<0xFF800000> : vector<128xf32>
    %85 = vector.multi_reduction <maximumf>, %84, %cst_21 [0] : vector<8x128xf32> to vector<128xf32>
    %86 = vector.shape_cast %85 : vector<128xf32> to vector<1x128xf32>
    %87 = vector.broadcast %86 : vector<1x128xf32> to vector<8x128xf32>
    %88 = arith.subf %84, %87 : vector<8x128xf32>
    %89 = math.exp %88 : vector<8x128xf32>
    %90 = vector.extract_strided_slice %0 {offsets = [0, 0], sizes = [8, 1], strides = [1, 1]} : vector<8x8xf32> to vector<8x1xf32>
    %91 = vector.extract_strided_slice %89 {offsets = [0, 0], sizes = [1, 128], strides = [1, 1]} : vector<8x128xf32> to vector<1x128xf32>
    %92 = vector.broadcast %90 : vector<8x1xf32> to vector<8x128xf32>
    %93 = vector.broadcast %91 : vector<1x128xf32> to vector<8x128xf32>
    %94 = arith.mulf %92, %93 : vector<8x128xf32>
    %95 = vector.extract_strided_slice %0 {offsets = [0, 1], sizes = [8, 1], strides = [1, 1]} : vector<8x8xf32> to vector<8x1xf32>
    %96 = vector.extract_strided_slice %89 {offsets = [1, 0], sizes = [1, 128], strides = [1, 1]} : vector<8x128xf32> to vector<1x128xf32>
    %97 = vector.broadcast %95 : vector<8x1xf32> to vector<8x128xf32>
    %98 = vector.broadcast %96 : vector<1x128xf32> to vector<8x128xf32>
    %99 = arith.mulf %97, %98 : vector<8x128xf32>
    %100 = arith.addf %94, %99 : vector<8x128xf32>
    %101 = vector.extract_strided_slice %0 {offsets = [0, 2], sizes = [8, 1], strides = [1, 1]} : vector<8x8xf32> to vector<8x1xf32>
    %102 = vector.extract_strided_slice %89 {offsets = [2, 0], sizes = [1, 128], strides = [1, 1]} : vector<8x128xf32> to vector<1x128xf32>
    %103 = vector.broadcast %101 : vector<8x1xf32> to vector<8x128xf32>
    %104 = vector.broadcast %102 : vector<1x128xf32> to vector<8x128xf32>
    %105 = arith.mulf %103, %104 : vector<8x128xf32>
    %106 = arith.addf %100, %105 : vector<8x128xf32>
    %107 = vector.extract_strided_slice %0 {offsets = [0, 3], sizes = [8, 1], strides = [1, 1]} : vector<8x8xf32> to vector<8x1xf32>
    %108 = vector.extract_strided_slice %89 {offsets = [3, 0], sizes = [1, 128], strides = [1, 1]} : vector<8x128xf32> to vector<1x128xf32>
    %109 = vector.broadcast %107 : vector<8x1xf32> to vector<8x128xf32>
    %110 = vector.broadcast %108 : vector<1x128xf32> to vector<8x128xf32>
    %111 = arith.mulf %109, %110 : vector<8x128xf32>
    %112 = arith.addf %106, %111 : vector<8x128xf32>
    %113 = vector.extract_strided_slice %0 {offsets = [0, 4], sizes = [8, 1], strides = [1, 1]} : vector<8x8xf32> to vector<8x1xf32>
    %114 = vector.extract_strided_slice %89 {offsets = [4, 0], sizes = [1, 128], strides = [1, 1]} : vector<8x128xf32> to vector<1x128xf32>
    %115 = vector.broadcast %113 : vector<8x1xf32> to vector<8x128xf32>
    %116 = vector.broadcast %114 : vector<1x128xf32> to vector<8x128xf32>
    %117 = arith.mulf %115, %116 : vector<8x128xf32>
    %118 = arith.addf %112, %117 : vector<8x128xf32>
    %119 = vector.extract_strided_slice %0 {offsets = [0, 5], sizes = [8, 1], strides = [1, 1]} : vector<8x8xf32> to vector<8x1xf32>
    %120 = vector.extract_strided_slice %89 {offsets = [5, 0], sizes = [1, 128], strides = [1, 1]} : vector<8x128xf32> to vector<1x128xf32>
    %121 = vector.broadcast %119 : vector<8x1xf32> to vector<8x128xf32>
    %122 = vector.broadcast %120 : vector<1x128xf32> to vector<8x128xf32>
    %123 = arith.mulf %121, %122 : vector<8x128xf32>
    %124 = arith.addf %118, %123 : vector<8x128xf32>
    %125 = vector.extract_strided_slice %0 {offsets = [0, 6], sizes = [8, 1], strides = [1, 1]} : vector<8x8xf32> to vector<8x1xf32>
    %126 = vector.extract_strided_slice %89 {offsets = [6, 0], sizes = [1, 128], strides = [1, 1]} : vector<8x128xf32> to vector<1x128xf32>
    %127 = vector.broadcast %125 : vector<8x1xf32> to vector<8x128xf32>
    %128 = vector.broadcast %126 : vector<1x128xf32> to vector<8x128xf32>
    %129 = arith.mulf %127, %128 : vector<8x128xf32>
    %130 = arith.addf %124, %129 : vector<8x128xf32>
    %131 = vector.extract_strided_slice %0 {offsets = [0, 7], sizes = [8, 1], strides = [1, 1]} : vector<8x8xf32> to vector<8x1xf32>
    %132 = vector.extract_strided_slice %89 {offsets = [7, 0], sizes = [1, 128], strides = [1, 1]} : vector<8x128xf32> to vector<1x128xf32>
    %133 = vector.broadcast %131 : vector<8x1xf32> to vector<8x128xf32>
    %134 = vector.broadcast %132 : vector<1x128xf32> to vector<8x128xf32>
    %135 = arith.mulf %133, %134 : vector<8x128xf32>
    %136 = arith.addf %130, %135 : vector<8x128xf32>
    %137 = vector.broadcast %86 : vector<1x128xf32> to vector<8x128xf32>
    %138 = arith.addf %78, %137 : vector<8x128xf32>
    %139 = vector.broadcast %1 : vector<8x1xf32> to vector<8x128xf32>
    %140 = arith.addf %138, %139 : vector<8x128xf32>
    %141 = math.log %136 : vector<8x128xf32>
    %142 = arith.addf %140, %141 : vector<8x128xf32>
    %143 = vector.shape_cast %83 : vector<1x128xi1> to vector<1x128xi1>
    %144 = vector.broadcast %143 : vector<1x128xi1> to vector<8x128xi1>
    %145 = arith.select %144, %142, %84 : vector<8x128xi1>, vector<8x128xf32>
    %c0_22 = arith.constant 0 : index
    %c0_23 = arith.constant 0 : index
    %146 = vector.load %arg8[%c0_22, %c0_23] : memref<8x128xf32, #tpu.memory_space<vmem>>, vector<8x128xf32>
    tpu.vector_store %arg8[%c0_22, %c0_23], %145 {strides = array<i32>} : memref<8x128xf32, #tpu.memory_space<vmem>>, vector<8x128xf32>,
    %c2_i32 = arith.constant 2 : i32
    %147 = arith.index_cast %c2_i32 : i32 to index
    %c0_24 = arith.constant 0 : index
    %c0_25 = arith.constant 0 : index
    %148 = vector.load %arg2[%147, %c0_24, %c0_25] : memref<8x8x128xf32, #tpu.memory_space<vmem>>, vector<1x8x128xf32>
    %149 = vector.shape_cast %148 : vector<1x8x128xf32> to vector<8x128xf32>
    %150 = arith.index_cast %c2_i32 : i32 to index
    %c0_26 = arith.constant 0 : index
    %c0_27 = arith.constant 0 : index
    %151 = vector.load %arg3[%150, %c0_26, %c0_27] : memref<8x1x128xf32, #tpu.memory_space<vmem>>, vector<1x1x128xf32>
    %152 = vector.shape_cast %151 : vector<1x1x128xf32> to vector<1x128xf32>
    %cst_28 = arith.constant 5.000000e-01 : f32
    %153 = vector.broadcast %cst_28 : f32 to vector<1x128xf32>
    %154 = arith.cmpf ogt, %152, %153 : vector<1x128xf32>
    %c0_29 = arith.constant 0 : index
    %c0_30 = arith.constant 0 : index
    %155 = vector.load %arg8[%c0_29, %c0_30] : memref<8x128xf32, #tpu.memory_space<vmem>>, vector<8x128xf32>
    %cst_31 = arith.constant dense<0xFF800000> : vector<128xf32>
    %156 = vector.multi_reduction <maximumf>, %155, %cst_31 [0] : vector<8x128xf32> to vector<128xf32>
    %157 = vector.shape_cast %156 : vector<128xf32> to vector<1x128xf32>
    %158 = vector.broadcast %157 : vector<1x128xf32> to vector<8x128xf32>
    %159 = arith.subf %155, %158 : vector<8x128xf32>
    %160 = math.exp %159 : vector<8x128xf32>
    %161 = vector.extract_strided_slice %0 {offsets = [0, 0], sizes = [8, 1], strides = [1, 1]} : vector<8x8xf32> to vector<8x1xf32>
    %162 = vector.extract_strided_slice %160 {offsets = [0, 0], sizes = [1, 128], strides = [1, 1]} : vector<8x128xf32> to vector<1x128xf32>
    %163 = vector.broadcast %161 : vector<8x1xf32> to vector<8x128xf32>
    %164 = vector.broadcast %162 : vector<1x128xf32> to vector<8x128xf32>
    %165 = arith.mulf %163, %164 : vector<8x128xf32>
    %166 = vector.extract_strided_slice %0 {offsets = [0, 1], sizes = [8, 1], strides = [1, 1]} : vector<8x8xf32> to vector<8x1xf32>
    %167 = vector.extract_strided_slice %160 {offsets = [1, 0], sizes = [1, 128], strides = [1, 1]} : vector<8x128xf32> to vector<1x128xf32>
    %168 = vector.broadcast %166 : vector<8x1xf32> to vector<8x128xf32>
    %169 = vector.broadcast %167 : vector<1x128xf32> to vector<8x128xf32>
    %170 = arith.mulf %168, %169 : vector<8x128xf32>
    %171 = arith.addf %165, %170 : vector<8x128xf32>
    %172 = vector.extract_strided_slice %0 {offsets = [0, 2], sizes = [8, 1], strides = [1, 1]} : vector<8x8xf32> to vector<8x1xf32>
    %173 = vector.extract_strided_slice %160 {offsets = [2, 0], sizes = [1, 128], strides = [1, 1]} : vector<8x128xf32> to vector<1x128xf32>
    %174 = vector.broadcast %172 : vector<8x1xf32> to vector<8x128xf32>
    %175 = vector.broadcast %173 : vector<1x128xf32> to vector<8x128xf32>
    %176 = arith.mulf %174, %175 : vector<8x128xf32>
    %177 = arith.addf %171, %176 : vector<8x128xf32>
    %178 = vector.extract_strided_slice %0 {offsets = [0, 3], sizes = [8, 1], strides = [1, 1]} : vector<8x8xf32> to vector<8x1xf32>
    %179 = vector.extract_strided_slice %160 {offsets = [3, 0], sizes = [1, 128], strides = [1, 1]} : vector<8x128xf32> to vector<1x128xf32>
    %180 = vector.broadcast %178 : vector<8x1xf32> to vector<8x128xf32>
    %181 = vector.broadcast %179 : vector<1x128xf32> to vector<8x128xf32>
    %182 = arith.mulf %180, %181 : vector<8x128xf32>
    %183 = arith.addf %177, %182 : vector<8x128xf32>
    %184 = vector.extract_strided_slice %0 {offsets = [0, 4], sizes = [8, 1], strides = [1, 1]} : vector<8x8xf32> to vector<8x1xf32>
    %185 = vector.extract_strided_slice %160 {offsets = [4, 0], sizes = [1, 128], strides = [1, 1]} : vector<8x128xf32> to vector<1x128xf32>
    %186 = vector.broadcast %184 : vector<8x1xf32> to vector<8x128xf32>
    %187 = vector.broadcast %185 : vector<1x128xf32> to vector<8x128xf32>
    %188 = arith.mulf %186, %187 : vector<8x128xf32>
    %189 = arith.addf %183, %188 : vector<8x128xf32>
    %190 = vector.extract_strided_slice %0 {offsets = [0, 5], sizes = [8, 1], strides = [1, 1]} : vector<8x8xf32> to vector<8x1xf32>
    %191 = vector.extract_strided_slice %160 {offsets = [5, 0], sizes = [1, 128], strides = [1, 1]} : vector<8x128xf32> to vector<1x128xf32>
    %192 = vector.broadcast %190 : vector<8x1xf32> to vector<8x128xf32>
    %193 = vector.broadcast %191 : vector<1x128xf32> to vector<8x128xf32>
    %194 = arith.mulf %192, %193 : vector<8x128xf32>
    %195 = arith.addf %189, %194 : vector<8x128xf32>
    %196 = vector.extract_strided_slice %0 {offsets = [0, 6], sizes = [8, 1], strides = [1, 1]} : vector<8x8xf32> to vector<8x1xf32>
    %197 = vector.extract_strided_slice %160 {offsets = [6, 0], sizes = [1, 128], strides = [1, 1]} : vector<8x128xf32> to vector<1x128xf32>
    %198 = vector.broadcast %196 : vector<8x1xf32> to vector<8x128xf32>
    %199 = vector.broadcast %197 : vector<1x128xf32> to vector<8x128xf32>
    %200 = arith.mulf %198, %199 : vector<8x128xf32>
    %201 = arith.addf %195, %200 : vector<8x128xf32>
    %202 = vector.extract_strided_slice %0 {offsets = [0, 7], sizes = [8, 1], strides = [1, 1]} : vector<8x8xf32> to vector<8x1xf32>
    %203 = vector.extract_strided_slice %160 {offsets = [7, 0], sizes = [1, 128], strides = [1, 1]} : vector<8x128xf32> to vector<1x128xf32>
    %204 = vector.broadcast %202 : vector<8x1xf32> to vector<8x128xf32>
    %205 = vector.broadcast %203 : vector<1x128xf32> to vector<8x128xf32>
    %206 = arith.mulf %204, %205 : vector<8x128xf32>
    %207 = arith.addf %201, %206 : vector<8x128xf32>
    %208 = vector.broadcast %157 : vector<1x128xf32> to vector<8x128xf32>
    %209 = arith.addf %149, %208 : vector<8x128xf32>
    %210 = vector.broadcast %1 : vector<8x1xf32> to vector<8x128xf32>
    %211 = arith.addf %209, %210 : vector<8x128xf32>
    %212 = math.log %207 : vector<8x128xf32>
    %213 = arith.addf %211, %212 : vector<8x128xf32>
    %214 = vector.shape_cast %154 : vector<1x128xi1> to vector<1x128xi1>
    %215 = vector.broadcast %214 : vector<1x128xi1> to vector<8x128xi1>
    %216 = arith.select %215, %213, %155 : vector<8x128xi1>, vector<8x128xf32>
    %c0_32 = arith.constant 0 : index
    %c0_33 = arith.constant 0 : index
    %217 = vector.load %arg8[%c0_32, %c0_33] : memref<8x128xf32, #tpu.memory_space<vmem>>, vector<8x128xf32>
    tpu.vector_store %arg8[%c0_32, %c0_33], %216 {strides = array<i32>} : memref<8x128xf32, #tpu.memory_space<vmem>>, vector<8x128xf32>,
    %c3_i32 = arith.constant 3 : i32
    %218 = arith.index_cast %c3_i32 : i32 to index
    %c0_34 = arith.constant 0 : index
    %c0_35 = arith.constant 0 : index
    %219 = vector.load %arg2[%218, %c0_34, %c0_35] : memref<8x8x128xf32, #tpu.memory_space<vmem>>, vector<1x8x128xf32>
    %220 = vector.shape_cast %219 : vector<1x8x128xf32> to vector<8x128xf32>
    %221 = arith.index_cast %c3_i32 : i32 to index
    %c0_36 = arith.constant 0 : index
    %c0_37 = arith.constant 0 : index
    %222 = vector.load %arg3[%221, %c0_36, %c0_37] : memref<8x1x128xf32, #tpu.memory_space<vmem>>, vector<1x1x128xf32>
    %223 = vector.shape_cast %222 : vector<1x1x128xf32> to vector<1x128xf32>
    %cst_38 = arith.constant 5.000000e-01 : f32
    %224 = vector.broadcast %cst_38 : f32 to vector<1x128xf32>
    %225 = arith.cmpf ogt, %223, %224 : vector<1x128xf32>
    %c0_39 = arith.constant 0 : index
    %c0_40 = arith.constant 0 : index
    %226 = vector.load %arg8[%c0_39, %c0_40] : memref<8x128xf32, #tpu.memory_space<vmem>>, vector<8x128xf32>
    %cst_41 = arith.constant dense<0xFF800000> : vector<128xf32>
    %227 = vector.multi_reduction <maximumf>, %226, %cst_41 [0] : vector<8x128xf32> to vector<128xf32>
    %228 = vector.shape_cast %227 : vector<128xf32> to vector<1x128xf32>
    %229 = vector.broadcast %228 : vector<1x128xf32> to vector<8x128xf32>
    %230 = arith.subf %226, %229 : vector<8x128xf32>
    %231 = math.exp %230 : vector<8x128xf32>
    %232 = vector.extract_strided_slice %0 {offsets = [0, 0], sizes = [8, 1], strides = [1, 1]} : vector<8x8xf32> to vector<8x1xf32>
    %233 = vector.extract_strided_slice %231 {offsets = [0, 0], sizes = [1, 128], strides = [1, 1]} : vector<8x128xf32> to vector<1x128xf32>
    %234 = vector.broadcast %232 : vector<8x1xf32> to vector<8x128xf32>
    %235 = vector.broadcast %233 : vector<1x128xf32> to vector<8x128xf32>
    %236 = arith.mulf %234, %235 : vector<8x128xf32>
    %237 = vector.extract_strided_slice %0 {offsets = [0, 1], sizes = [8, 1], strides = [1, 1]} : vector<8x8xf32> to vector<8x1xf32>
    %238 = vector.extract_strided_slice %231 {offsets = [1, 0], sizes = [1, 128], strides = [1, 1]} : vector<8x128xf32> to vector<1x128xf32>
    %239 = vector.broadcast %237 : vector<8x1xf32> to vector<8x128xf32>
    %240 = vector.broadcast %238 : vector<1x128xf32> to vector<8x128xf32>
    %241 = arith.mulf %239, %240 : vector<8x128xf32>
    %242 = arith.addf %236, %241 : vector<8x128xf32>
    %243 = vector.extract_strided_slice %0 {offsets = [0, 2], sizes = [8, 1], strides = [1, 1]} : vector<8x8xf32> to vector<8x1xf32>
    %244 = vector.extract_strided_slice %231 {offsets = [2, 0], sizes = [1, 128], strides = [1, 1]} : vector<8x128xf32> to vector<1x128xf32>
    %245 = vector.broadcast %243 : vector<8x1xf32> to vector<8x128xf32>
    %246 = vector.broadcast %244 : vector<1x128xf32> to vector<8x128xf32>
    %247 = arith.mulf %245, %246 : vector<8x128xf32>
    %248 = arith.addf %242, %247 : vector<8x128xf32>
    %249 = vector.extract_strided_slice %0 {offsets = [0, 3], sizes = [8, 1], strides = [1, 1]} : vector<8x8xf32> to vector<8x1xf32>
    %250 = vector.extract_strided_slice %231 {offsets = [3, 0], sizes = [1, 128], strides = [1, 1]} : vector<8x128xf32> to vector<1x128xf32>
    %251 = vector.broadcast %249 : vector<8x1xf32> to vector<8x128xf32>
    %252 = vector.broadcast %250 : vector<1x128xf32> to vector<8x128xf32>
    %253 = arith.mulf %251, %252 : vector<8x128xf32>
    %254 = arith.addf %248, %253 : vector<8x128xf32>
    %255 = vector.extract_strided_slice %0 {offsets = [0, 4], sizes = [8, 1], strides = [1, 1]} : vector<8x8xf32> to vector<8x1xf32>
    %256 = vector.extract_strided_slice %231 {offsets = [4, 0], sizes = [1, 128], strides = [1, 1]} : vector<8x128xf32> to vector<1x128xf32>
    %257 = vector.broadcast %255 : vector<8x1xf32> to vector<8x128xf32>
    %258 = vector.broadcast %256 : vector<1x128xf32> to vector<8x128xf32>
    %259 = arith.mulf %257, %258 : vector<8x128xf32>
    %260 = arith.addf %254, %259 : vector<8x128xf32>
    %261 = vector.extract_strided_slice %0 {offsets = [0, 5], sizes = [8, 1], strides = [1, 1]} : vector<8x8xf32> to vector<8x1xf32>
    %262 = vector.extract_strided_slice %231 {offsets = [5, 0], sizes = [1, 128], strides = [1, 1]} : vector<8x128xf32> to vector<1x128xf32>
    %263 = vector.broadcast %261 : vector<8x1xf32> to vector<8x128xf32>
    %264 = vector.broadcast %262 : vector<1x128xf32> to vector<8x128xf32>
    %265 = arith.mulf %263, %264 : vector<8x128xf32>
    %266 = arith.addf %260, %265 : vector<8x128xf32>
    %267 = vector.extract_strided_slice %0 {offsets = [0, 6], sizes = [8, 1], strides = [1, 1]} : vector<8x8xf32> to vector<8x1xf32>
    %268 = vector.extract_strided_slice %231 {offsets = [6, 0], sizes = [1, 128], strides = [1, 1]} : vector<8x128xf32> to vector<1x128xf32>
    %269 = vector.broadcast %267 : vector<8x1xf32> to vector<8x128xf32>
    %270 = vector.broadcast %268 : vector<1x128xf32> to vector<8x128xf32>
    %271 = arith.mulf %269, %270 : vector<8x128xf32>
    %272 = arith.addf %266, %271 : vector<8x128xf32>
    %273 = vector.extract_strided_slice %0 {offsets = [0, 7], sizes = [8, 1], strides = [1, 1]} : vector<8x8xf32> to vector<8x1xf32>
    %274 = vector.extract_strided_slice %231 {offsets = [7, 0], sizes = [1, 128], strides = [1, 1]} : vector<8x128xf32> to vector<1x128xf32>
    %275 = vector.broadcast %273 : vector<8x1xf32> to vector<8x128xf32>
    %276 = vector.broadcast %274 : vector<1x128xf32> to vector<8x128xf32>
    %277 = arith.mulf %275, %276 : vector<8x128xf32>
    %278 = arith.addf %272, %277 : vector<8x128xf32>
    %279 = vector.broadcast %228 : vector<1x128xf32> to vector<8x128xf32>
    %280 = arith.addf %220, %279 : vector<8x128xf32>
    %281 = vector.broadcast %1 : vector<8x1xf32> to vector<8x128xf32>
    %282 = arith.addf %280, %281 : vector<8x128xf32>
    %283 = math.log %278 : vector<8x128xf32>
    %284 = arith.addf %282, %283 : vector<8x128xf32>
    %285 = vector.shape_cast %225 : vector<1x128xi1> to vector<1x128xi1>
    %286 = vector.broadcast %285 : vector<1x128xi1> to vector<8x128xi1>
    %287 = arith.select %286, %284, %226 : vector<8x128xi1>, vector<8x128xf32>
    %c0_42 = arith.constant 0 : index
    %c0_43 = arith.constant 0 : index
    %288 = vector.load %arg8[%c0_42, %c0_43] : memref<8x128xf32, #tpu.memory_space<vmem>>, vector<8x128xf32>
    tpu.vector_store %arg8[%c0_42, %c0_43], %287 {strides = array<i32>} : memref<8x128xf32, #tpu.memory_space<vmem>>, vector<8x128xf32>,
    %c4_i32 = arith.constant 4 : i32
    %289 = arith.index_cast %c4_i32 : i32 to index
    %c0_44 = arith.constant 0 : index
    %c0_45 = arith.constant 0 : index
    %290 = vector.load %arg2[%289, %c0_44, %c0_45] : memref<8x8x128xf32, #tpu.memory_space<vmem>>, vector<1x8x128xf32>
    %291 = vector.shape_cast %290 : vector<1x8x128xf32> to vector<8x128xf32>
    %292 = arith.index_cast %c4_i32 : i32 to index
    %c0_46 = arith.constant 0 : index
    %c0_47 = arith.constant 0 : index
    %293 = vector.load %arg3[%292, %c0_46, %c0_47] : memref<8x1x128xf32, #tpu.memory_space<vmem>>, vector<1x1x128xf32>
    %294 = vector.shape_cast %293 : vector<1x1x128xf32> to vector<1x128xf32>
    %cst_48 = arith.constant 5.000000e-01 : f32
    %295 = vector.broadcast %cst_48 : f32 to vector<1x128xf32>
    %296 = arith.cmpf ogt, %294, %295 : vector<1x128xf32>
    %c0_49 = arith.constant 0 : index
    %c0_50 = arith.constant 0 : index
    %297 = vector.load %arg8[%c0_49, %c0_50] : memref<8x128xf32, #tpu.memory_space<vmem>>, vector<8x128xf32>
    %cst_51 = arith.constant dense<0xFF800000> : vector<128xf32>
    %298 = vector.multi_reduction <maximumf>, %297, %cst_51 [0] : vector<8x128xf32> to vector<128xf32>
    %299 = vector.shape_cast %298 : vector<128xf32> to vector<1x128xf32>
    %300 = vector.broadcast %299 : vector<1x128xf32> to vector<8x128xf32>
    %301 = arith.subf %297, %300 : vector<8x128xf32>
    %302 = math.exp %301 : vector<8x128xf32>
    %303 = vector.extract_strided_slice %0 {offsets = [0, 0], sizes = [8, 1], strides = [1, 1]} : vector<8x8xf32> to vector<8x1xf32>
    %304 = vector.extract_strided_slice %302 {offsets = [0, 0], sizes = [1, 128], strides = [1, 1]} : vector<8x128xf32> to vector<1x128xf32>
    %305 = vector.broadcast %303 : vector<8x1xf32> to vector<8x128xf32>
    %306 = vector.broadcast %304 : vector<1x128xf32> to vector<8x128xf32>
    %307 = arith.mulf %305, %306 : vector<8x128xf32>
    %308 = vector.extract_strided_slice %0 {offsets = [0, 1], sizes = [8, 1], strides = [1, 1]} : vector<8x8xf32> to vector<8x1xf32>
    %309 = vector.extract_strided_slice %302 {offsets = [1, 0], sizes = [1, 128], strides = [1, 1]} : vector<8x128xf32> to vector<1x128xf32>
    %310 = vector.broadcast %308 : vector<8x1xf32> to vector<8x128xf32>
    %311 = vector.broadcast %309 : vector<1x128xf32> to vector<8x128xf32>
    %312 = arith.mulf %310, %311 : vector<8x128xf32>
    %313 = arith.addf %307, %312 : vector<8x128xf32>
    %314 = vector.extract_strided_slice %0 {offsets = [0, 2], sizes = [8, 1], strides = [1, 1]} : vector<8x8xf32> to vector<8x1xf32>
    %315 = vector.extract_strided_slice %302 {offsets = [2, 0], sizes = [1, 128], strides = [1, 1]} : vector<8x128xf32> to vector<1x128xf32>
    %316 = vector.broadcast %314 : vector<8x1xf32> to vector<8x128xf32>
    %317 = vector.broadcast %315 : vector<1x128xf32> to vector<8x128xf32>
    %318 = arith.mulf %316, %317 : vector<8x128xf32>
    %319 = arith.addf %313, %318 : vector<8x128xf32>
    %320 = vector.extract_strided_slice %0 {offsets = [0, 3], sizes = [8, 1], strides = [1, 1]} : vector<8x8xf32> to vector<8x1xf32>
    %321 = vector.extract_strided_slice %302 {offsets = [3, 0], sizes = [1, 128], strides = [1, 1]} : vector<8x128xf32> to vector<1x128xf32>
    %322 = vector.broadcast %320 : vector<8x1xf32> to vector<8x128xf32>
    %323 = vector.broadcast %321 : vector<1x128xf32> to vector<8x128xf32>
    %324 = arith.mulf %322, %323 : vector<8x128xf32>
    %325 = arith.addf %319, %324 : vector<8x128xf32>
    %326 = vector.extract_strided_slice %0 {offsets = [0, 4], sizes = [8, 1], strides = [1, 1]} : vector<8x8xf32> to vector<8x1xf32>
    %327 = vector.extract_strided_slice %302 {offsets = [4, 0], sizes = [1, 128], strides = [1, 1]} : vector<8x128xf32> to vector<1x128xf32>
    %328 = vector.broadcast %326 : vector<8x1xf32> to vector<8x128xf32>
    %329 = vector.broadcast %327 : vector<1x128xf32> to vector<8x128xf32>
    %330 = arith.mulf %328, %329 : vector<8x128xf32>
    %331 = arith.addf %325, %330 : vector<8x128xf32>
    %332 = vector.extract_strided_slice %0 {offsets = [0, 5], sizes = [8, 1], strides = [1, 1]} : vector<8x8xf32> to vector<8x1xf32>
    %333 = vector.extract_strided_slice %302 {offsets = [5, 0], sizes = [1, 128], strides = [1, 1]} : vector<8x128xf32> to vector<1x128xf32>
    %334 = vector.broadcast %332 : vector<8x1xf32> to vector<8x128xf32>
    %335 = vector.broadcast %333 : vector<1x128xf32> to vector<8x128xf32>
    %336 = arith.mulf %334, %335 : vector<8x128xf32>
    %337 = arith.addf %331, %336 : vector<8x128xf32>
    %338 = vector.extract_strided_slice %0 {offsets = [0, 6], sizes = [8, 1], strides = [1, 1]} : vector<8x8xf32> to vector<8x1xf32>
    %339 = vector.extract_strided_slice %302 {offsets = [6, 0], sizes = [1, 128], strides = [1, 1]} : vector<8x128xf32> to vector<1x128xf32>
    %340 = vector.broadcast %338 : vector<8x1xf32> to vector<8x128xf32>
    %341 = vector.broadcast %339 : vector<1x128xf32> to vector<8x128xf32>
    %342 = arith.mulf %340, %341 : vector<8x128xf32>
    %343 = arith.addf %337, %342 : vector<8x128xf32>
    %344 = vector.extract_strided_slice %0 {offsets = [0, 7], sizes = [8, 1], strides = [1, 1]} : vector<8x8xf32> to vector<8x1xf32>
    %345 = vector.extract_strided_slice %302 {offsets = [7, 0], sizes = [1, 128], strides = [1, 1]} : vector<8x128xf32> to vector<1x128xf32>
    %346 = vector.broadcast %344 : vector<8x1xf32> to vector<8x128xf32>
    %347 = vector.broadcast %345 : vector<1x128xf32> to vector<8x128xf32>
    %348 = arith.mulf %346, %347 : vector<8x128xf32>
    %349 = arith.addf %343, %348 : vector<8x128xf32>
    %350 = vector.broadcast %299 : vector<1x128xf32> to vector<8x128xf32>
    %351 = arith.addf %291, %350 : vector<8x128xf32>
    %352 = vector.broadcast %1 : vector<8x1xf32> to vector<8x128xf32>
    %353 = arith.addf %351, %352 : vector<8x128xf32>
    %354 = math.log %349 : vector<8x128xf32>
    %355 = arith.addf %353, %354 : vector<8x128xf32>
    %356 = vector.shape_cast %296 : vector<1x128xi1> to vector<1x128xi1>
    %357 = vector.broadcast %356 : vector<1x128xi1> to vector<8x128xi1>
    %358 = arith.select %357, %355, %297 : vector<8x128xi1>, vector<8x128xf32>
    %c0_52 = arith.constant 0 : index
    %c0_53 = arith.constant 0 : index
    %359 = vector.load %arg8[%c0_52, %c0_53] : memref<8x128xf32, #tpu.memory_space<vmem>>, vector<8x128xf32>
    tpu.vector_store %arg8[%c0_52, %c0_53], %358 {strides = array<i32>} : memref<8x128xf32, #tpu.memory_space<vmem>>, vector<8x128xf32>,
    %c5_i32 = arith.constant 5 : i32
    %360 = arith.index_cast %c5_i32 : i32 to index
    %c0_54 = arith.constant 0 : index
    %c0_55 = arith.constant 0 : index
    %361 = vector.load %arg2[%360, %c0_54, %c0_55] : memref<8x8x128xf32, #tpu.memory_space<vmem>>, vector<1x8x128xf32>
    %362 = vector.shape_cast %361 : vector<1x8x128xf32> to vector<8x128xf32>
    %363 = arith.index_cast %c5_i32 : i32 to index
    %c0_56 = arith.constant 0 : index
    %c0_57 = arith.constant 0 : index
    %364 = vector.load %arg3[%363, %c0_56, %c0_57] : memref<8x1x128xf32, #tpu.memory_space<vmem>>, vector<1x1x128xf32>
    %365 = vector.shape_cast %364 : vector<1x1x128xf32> to vector<1x128xf32>
    %cst_58 = arith.constant 5.000000e-01 : f32
    %366 = vector.broadcast %cst_58 : f32 to vector<1x128xf32>
    %367 = arith.cmpf ogt, %365, %366 : vector<1x128xf32>
    %c0_59 = arith.constant 0 : index
    %c0_60 = arith.constant 0 : index
    %368 = vector.load %arg8[%c0_59, %c0_60] : memref<8x128xf32, #tpu.memory_space<vmem>>, vector<8x128xf32>
    %cst_61 = arith.constant dense<0xFF800000> : vector<128xf32>
    %369 = vector.multi_reduction <maximumf>, %368, %cst_61 [0] : vector<8x128xf32> to vector<128xf32>
    %370 = vector.shape_cast %369 : vector<128xf32> to vector<1x128xf32>
    %371 = vector.broadcast %370 : vector<1x128xf32> to vector<8x128xf32>
    %372 = arith.subf %368, %371 : vector<8x128xf32>
    %373 = math.exp %372 : vector<8x128xf32>
    %374 = vector.extract_strided_slice %0 {offsets = [0, 0], sizes = [8, 1], strides = [1, 1]} : vector<8x8xf32> to vector<8x1xf32>
    %375 = vector.extract_strided_slice %373 {offsets = [0, 0], sizes = [1, 128], strides = [1, 1]} : vector<8x128xf32> to vector<1x128xf32>
    %376 = vector.broadcast %374 : vector<8x1xf32> to vector<8x128xf32>
    %377 = vector.broadcast %375 : vector<1x128xf32> to vector<8x128xf32>
    %378 = arith.mulf %376, %377 : vector<8x128xf32>
    %379 = vector.extract_strided_slice %0 {offsets = [0, 1], sizes = [8, 1], strides = [1, 1]} : vector<8x8xf32> to vector<8x1xf32>
    %380 = vector.extract_strided_slice %373 {offsets = [1, 0], sizes = [1, 128], strides = [1, 1]} : vector<8x128xf32> to vector<1x128xf32>
    %381 = vector.broadcast %379 : vector<8x1xf32> to vector<8x128xf32>
    %382 = vector.broadcast %380 : vector<1x128xf32> to vector<8x128xf32>
    %383 = arith.mulf %381, %382 : vector<8x128xf32>
    %384 = arith.addf %378, %383 : vector<8x128xf32>
    %385 = vector.extract_strided_slice %0 {offsets = [0, 2], sizes = [8, 1], strides = [1, 1]} : vector<8x8xf32> to vector<8x1xf32>
    %386 = vector.extract_strided_slice %373 {offsets = [2, 0], sizes = [1, 128], strides = [1, 1]} : vector<8x128xf32> to vector<1x128xf32>
    %387 = vector.broadcast %385 : vector<8x1xf32> to vector<8x128xf32>
    %388 = vector.broadcast %386 : vector<1x128xf32> to vector<8x128xf32>
    %389 = arith.mulf %387, %388 : vector<8x128xf32>
    %390 = arith.addf %384, %389 : vector<8x128xf32>
    %391 = vector.extract_strided_slice %0 {offsets = [0, 3], sizes = [8, 1], strides = [1, 1]} : vector<8x8xf32> to vector<8x1xf32>
    %392 = vector.extract_strided_slice %373 {offsets = [3, 0], sizes = [1, 128], strides = [1, 1]} : vector<8x128xf32> to vector<1x128xf32>
    %393 = vector.broadcast %391 : vector<8x1xf32> to vector<8x128xf32>
    %394 = vector.broadcast %392 : vector<1x128xf32> to vector<8x128xf32>
    %395 = arith.mulf %393, %394 : vector<8x128xf32>
    %396 = arith.addf %390, %395 : vector<8x128xf32>
    %397 = vector.extract_strided_slice %0 {offsets = [0, 4], sizes = [8, 1], strides = [1, 1]} : vector<8x8xf32> to vector<8x1xf32>
    %398 = vector.extract_strided_slice %373 {offsets = [4, 0], sizes = [1, 128], strides = [1, 1]} : vector<8x128xf32> to vector<1x128xf32>
    %399 = vector.broadcast %397 : vector<8x1xf32> to vector<8x128xf32>
    %400 = vector.broadcast %398 : vector<1x128xf32> to vector<8x128xf32>
    %401 = arith.mulf %399, %400 : vector<8x128xf32>
    %402 = arith.addf %396, %401 : vector<8x128xf32>
    %403 = vector.extract_strided_slice %0 {offsets = [0, 5], sizes = [8, 1], strides = [1, 1]} : vector<8x8xf32> to vector<8x1xf32>
    %404 = vector.extract_strided_slice %373 {offsets = [5, 0], sizes = [1, 128], strides = [1, 1]} : vector<8x128xf32> to vector<1x128xf32>
    %405 = vector.broadcast %403 : vector<8x1xf32> to vector<8x128xf32>
    %406 = vector.broadcast %404 : vector<1x128xf32> to vector<8x128xf32>
    %407 = arith.mulf %405, %406 : vector<8x128xf32>
    %408 = arith.addf %402, %407 : vector<8x128xf32>
    %409 = vector.extract_strided_slice %0 {offsets = [0, 6], sizes = [8, 1], strides = [1, 1]} : vector<8x8xf32> to vector<8x1xf32>
    %410 = vector.extract_strided_slice %373 {offsets = [6, 0], sizes = [1, 128], strides = [1, 1]} : vector<8x128xf32> to vector<1x128xf32>
    %411 = vector.broadcast %409 : vector<8x1xf32> to vector<8x128xf32>
    %412 = vector.broadcast %410 : vector<1x128xf32> to vector<8x128xf32>
    %413 = arith.mulf %411, %412 : vector<8x128xf32>
    %414 = arith.addf %408, %413 : vector<8x128xf32>
    %415 = vector.extract_strided_slice %0 {offsets = [0, 7], sizes = [8, 1], strides = [1, 1]} : vector<8x8xf32> to vector<8x1xf32>
    %416 = vector.extract_strided_slice %373 {offsets = [7, 0], sizes = [1, 128], strides = [1, 1]} : vector<8x128xf32> to vector<1x128xf32>
    %417 = vector.broadcast %415 : vector<8x1xf32> to vector<8x128xf32>
    %418 = vector.broadcast %416 : vector<1x128xf32> to vector<8x128xf32>
    %419 = arith.mulf %417, %418 : vector<8x128xf32>
    %420 = arith.addf %414, %419 : vector<8x128xf32>
    %421 = vector.broadcast %370 : vector<1x128xf32> to vector<8x128xf32>
    %422 = arith.addf %362, %421 : vector<8x128xf32>
    %423 = vector.broadcast %1 : vector<8x1xf32> to vector<8x128xf32>
    %424 = arith.addf %422, %423 : vector<8x128xf32>
    %425 = math.log %420 : vector<8x128xf32>
    %426 = arith.addf %424, %425 : vector<8x128xf32>
    %427 = vector.shape_cast %367 : vector<1x128xi1> to vector<1x128xi1>
    %428 = vector.broadcast %427 : vector<1x128xi1> to vector<8x128xi1>
    %429 = arith.select %428, %426, %368 : vector<8x128xi1>, vector<8x128xf32>
    %c0_62 = arith.constant 0 : index
    %c0_63 = arith.constant 0 : index
    %430 = vector.load %arg8[%c0_62, %c0_63] : memref<8x128xf32, #tpu.memory_space<vmem>>, vector<8x128xf32>
    tpu.vector_store %arg8[%c0_62, %c0_63], %429 {strides = array<i32>} : memref<8x128xf32, #tpu.memory_space<vmem>>, vector<8x128xf32>,
    %c6_i32 = arith.constant 6 : i32
    %431 = arith.index_cast %c6_i32 : i32 to index
    %c0_64 = arith.constant 0 : index
    %c0_65 = arith.constant 0 : index
    %432 = vector.load %arg2[%431, %c0_64, %c0_65] : memref<8x8x128xf32, #tpu.memory_space<vmem>>, vector<1x8x128xf32>
    %433 = vector.shape_cast %432 : vector<1x8x128xf32> to vector<8x128xf32>
    %434 = arith.index_cast %c6_i32 : i32 to index
    %c0_66 = arith.constant 0 : index
    %c0_67 = arith.constant 0 : index
    %435 = vector.load %arg3[%434, %c0_66, %c0_67] : memref<8x1x128xf32, #tpu.memory_space<vmem>>, vector<1x1x128xf32>
    %436 = vector.shape_cast %435 : vector<1x1x128xf32> to vector<1x128xf32>
    %cst_68 = arith.constant 5.000000e-01 : f32
    %437 = vector.broadcast %cst_68 : f32 to vector<1x128xf32>
    %438 = arith.cmpf ogt, %436, %437 : vector<1x128xf32>
    %c0_69 = arith.constant 0 : index
    %c0_70 = arith.constant 0 : index
    %439 = vector.load %arg8[%c0_69, %c0_70] : memref<8x128xf32, #tpu.memory_space<vmem>>, vector<8x128xf32>
    %cst_71 = arith.constant dense<0xFF800000> : vector<128xf32>
    %440 = vector.multi_reduction <maximumf>, %439, %cst_71 [0] : vector<8x128xf32> to vector<128xf32>
    %441 = vector.shape_cast %440 : vector<128xf32> to vector<1x128xf32>
    %442 = vector.broadcast %441 : vector<1x128xf32> to vector<8x128xf32>
    %443 = arith.subf %439, %442 : vector<8x128xf32>
    %444 = math.exp %443 : vector<8x128xf32>
    %445 = vector.extract_strided_slice %0 {offsets = [0, 0], sizes = [8, 1], strides = [1, 1]} : vector<8x8xf32> to vector<8x1xf32>
    %446 = vector.extract_strided_slice %444 {offsets = [0, 0], sizes = [1, 128], strides = [1, 1]} : vector<8x128xf32> to vector<1x128xf32>
    %447 = vector.broadcast %445 : vector<8x1xf32> to vector<8x128xf32>
    %448 = vector.broadcast %446 : vector<1x128xf32> to vector<8x128xf32>
    %449 = arith.mulf %447, %448 : vector<8x128xf32>
    %450 = vector.extract_strided_slice %0 {offsets = [0, 1], sizes = [8, 1], strides = [1, 1]} : vector<8x8xf32> to vector<8x1xf32>
    %451 = vector.extract_strided_slice %444 {offsets = [1, 0], sizes = [1, 128], strides = [1, 1]} : vector<8x128xf32> to vector<1x128xf32>
    %452 = vector.broadcast %450 : vector<8x1xf32> to vector<8x128xf32>
    %453 = vector.broadcast %451 : vector<1x128xf32> to vector<8x128xf32>
    %454 = arith.mulf %452, %453 : vector<8x128xf32>
    %455 = arith.addf %449, %454 : vector<8x128xf32>
    %456 = vector.extract_strided_slice %0 {offsets = [0, 2], sizes = [8, 1], strides = [1, 1]} : vector<8x8xf32> to vector<8x1xf32>
    %457 = vector.extract_strided_slice %444 {offsets = [2, 0], sizes = [1, 128], strides = [1, 1]} : vector<8x128xf32> to vector<1x128xf32>
    %458 = vector.broadcast %456 : vector<8x1xf32> to vector<8x128xf32>
    %459 = vector.broadcast %457 : vector<1x128xf32> to vector<8x128xf32>
    %460 = arith.mulf %458, %459 : vector<8x128xf32>
    %461 = arith.addf %455, %460 : vector<8x128xf32>
    %462 = vector.extract_strided_slice %0 {offsets = [0, 3], sizes = [8, 1], strides = [1, 1]} : vector<8x8xf32> to vector<8x1xf32>
    %463 = vector.extract_strided_slice %444 {offsets = [3, 0], sizes = [1, 128], strides = [1, 1]} : vector<8x128xf32> to vector<1x128xf32>
    %464 = vector.broadcast %462 : vector<8x1xf32> to vector<8x128xf32>
    %465 = vector.broadcast %463 : vector<1x128xf32> to vector<8x128xf32>
    %466 = arith.mulf %464, %465 : vector<8x128xf32>
    %467 = arith.addf %461, %466 : vector<8x128xf32>
    %468 = vector.extract_strided_slice %0 {offsets = [0, 4], sizes = [8, 1], strides = [1, 1]} : vector<8x8xf32> to vector<8x1xf32>
    %469 = vector.extract_strided_slice %444 {offsets = [4, 0], sizes = [1, 128], strides = [1, 1]} : vector<8x128xf32> to vector<1x128xf32>
    %470 = vector.broadcast %468 : vector<8x1xf32> to vector<8x128xf32>
    %471 = vector.broadcast %469 : vector<1x128xf32> to vector<8x128xf32>
    %472 = arith.mulf %470, %471 : vector<8x128xf32>
    %473 = arith.addf %467, %472 : vector<8x128xf32>
    %474 = vector.extract_strided_slice %0 {offsets = [0, 5], sizes = [8, 1], strides = [1, 1]} : vector<8x8xf32> to vector<8x1xf32>
    %475 = vector.extract_strided_slice %444 {offsets = [5, 0], sizes = [1, 128], strides = [1, 1]} : vector<8x128xf32> to vector<1x128xf32>
    %476 = vector.broadcast %474 : vector<8x1xf32> to vector<8x128xf32>
    %477 = vector.broadcast %475 : vector<1x128xf32> to vector<8x128xf32>
    %478 = arith.mulf %476, %477 : vector<8x128xf32>
    %479 = arith.addf %473, %478 : vector<8x128xf32>
    %480 = vector.extract_strided_slice %0 {offsets = [0, 6], sizes = [8, 1], strides = [1, 1]} : vector<8x8xf32> to vector<8x1xf32>
    %481 = vector.extract_strided_slice %444 {offsets = [6, 0], sizes = [1, 128], strides = [1, 1]} : vector<8x128xf32> to vector<1x128xf32>
    %482 = vector.broadcast %480 : vector<8x1xf32> to vector<8x128xf32>
    %483 = vector.broadcast %481 : vector<1x128xf32> to vector<8x128xf32>
    %484 = arith.mulf %482, %483 : vector<8x128xf32>
    %485 = arith.addf %479, %484 : vector<8x128xf32>
    %486 = vector.extract_strided_slice %0 {offsets = [0, 7], sizes = [8, 1], strides = [1, 1]} : vector<8x8xf32> to vector<8x1xf32>
    %487 = vector.extract_strided_slice %444 {offsets = [7, 0], sizes = [1, 128], strides = [1, 1]} : vector<8x128xf32> to vector<1x128xf32>
    %488 = vector.broadcast %486 : vector<8x1xf32> to vector<8x128xf32>
    %489 = vector.broadcast %487 : vector<1x128xf32> to vector<8x128xf32>
    %490 = arith.mulf %488, %489 : vector<8x128xf32>
    %491 = arith.addf %485, %490 : vector<8x128xf32>
    %492 = vector.broadcast %441 : vector<1x128xf32> to vector<8x128xf32>
    %493 = arith.addf %433, %492 : vector<8x128xf32>
    %494 = vector.broadcast %1 : vector<8x1xf32> to vector<8x128xf32>
    %495 = arith.addf %493, %494 : vector<8x128xf32>
    %496 = math.log %491 : vector<8x128xf32>
    %497 = arith.addf %495, %496 : vector<8x128xf32>
    %498 = vector.shape_cast %438 : vector<1x128xi1> to vector<1x128xi1>
    %499 = vector.broadcast %498 : vector<1x128xi1> to vector<8x128xi1>
    %500 = arith.select %499, %497, %439 : vector<8x128xi1>, vector<8x128xf32>
    %c0_72 = arith.constant 0 : index
    %c0_73 = arith.constant 0 : index
    %501 = vector.load %arg8[%c0_72, %c0_73] : memref<8x128xf32, #tpu.memory_space<vmem>>, vector<8x128xf32>
    tpu.vector_store %arg8[%c0_72, %c0_73], %500 {strides = array<i32>} : memref<8x128xf32, #tpu.memory_space<vmem>>, vector<8x128xf32>,
    %c7_i32 = arith.constant 7 : i32
    %502 = arith.index_cast %c7_i32 : i32 to index
    %c0_74 = arith.constant 0 : index
    %c0_75 = arith.constant 0 : index
    %503 = vector.load %arg2[%502, %c0_74, %c0_75] : memref<8x8x128xf32, #tpu.memory_space<vmem>>, vector<1x8x128xf32>
    %504 = vector.shape_cast %503 : vector<1x8x128xf32> to vector<8x128xf32>
    %505 = arith.index_cast %c7_i32 : i32 to index
    %c0_76 = arith.constant 0 : index
    %c0_77 = arith.constant 0 : index
    %506 = vector.load %arg3[%505, %c0_76, %c0_77] : memref<8x1x128xf32, #tpu.memory_space<vmem>>, vector<1x1x128xf32>
    %507 = vector.shape_cast %506 : vector<1x1x128xf32> to vector<1x128xf32>
    %cst_78 = arith.constant 5.000000e-01 : f32
    %508 = vector.broadcast %cst_78 : f32 to vector<1x128xf32>
    %509 = arith.cmpf ogt, %507, %508 : vector<1x128xf32>
    %c0_79 = arith.constant 0 : index
    %c0_80 = arith.constant 0 : index
    %510 = vector.load %arg8[%c0_79, %c0_80] : memref<8x128xf32, #tpu.memory_space<vmem>>, vector<8x128xf32>
    %cst_81 = arith.constant dense<0xFF800000> : vector<128xf32>
    %511 = vector.multi_reduction <maximumf>, %510, %cst_81 [0] : vector<8x128xf32> to vector<128xf32>
    %512 = vector.shape_cast %511 : vector<128xf32> to vector<1x128xf32>
    %513 = vector.broadcast %512 : vector<1x128xf32> to vector<8x128xf32>
    %514 = arith.subf %510, %513 : vector<8x128xf32>
    %515 = math.exp %514 : vector<8x128xf32>
    %516 = vector.extract_strided_slice %0 {offsets = [0, 0], sizes = [8, 1], strides = [1, 1]} : vector<8x8xf32> to vector<8x1xf32>
    %517 = vector.extract_strided_slice %515 {offsets = [0, 0], sizes = [1, 128], strides = [1, 1]} : vector<8x128xf32> to vector<1x128xf32>
    %518 = vector.broadcast %516 : vector<8x1xf32> to vector<8x128xf32>
    %519 = vector.broadcast %517 : vector<1x128xf32> to vector<8x128xf32>
    %520 = arith.mulf %518, %519 : vector<8x128xf32>
    %521 = vector.extract_strided_slice %0 {offsets = [0, 1], sizes = [8, 1], strides = [1, 1]} : vector<8x8xf32> to vector<8x1xf32>
    %522 = vector.extract_strided_slice %515 {offsets = [1, 0], sizes = [1, 128], strides = [1, 1]} : vector<8x128xf32> to vector<1x128xf32>
    %523 = vector.broadcast %521 : vector<8x1xf32> to vector<8x128xf32>
    %524 = vector.broadcast %522 : vector<1x128xf32> to vector<8x128xf32>
    %525 = arith.mulf %523, %524 : vector<8x128xf32>
    %526 = arith.addf %520, %525 : vector<8x128xf32>
    %527 = vector.extract_strided_slice %0 {offsets = [0, 2], sizes = [8, 1], strides = [1, 1]} : vector<8x8xf32> to vector<8x1xf32>
    %528 = vector.extract_strided_slice %515 {offsets = [2, 0], sizes = [1, 128], strides = [1, 1]} : vector<8x128xf32> to vector<1x128xf32>
    %529 = vector.broadcast %527 : vector<8x1xf32> to vector<8x128xf32>
    %530 = vector.broadcast %528 : vector<1x128xf32> to vector<8x128xf32>
    %531 = arith.mulf %529, %530 : vector<8x128xf32>
    %532 = arith.addf %526, %531 : vector<8x128xf32>
    %533 = vector.extract_strided_slice %0 {offsets = [0, 3], sizes = [8, 1], strides = [1, 1]} : vector<8x8xf32> to vector<8x1xf32>
    %534 = vector.extract_strided_slice %515 {offsets = [3, 0], sizes = [1, 128], strides = [1, 1]} : vector<8x128xf32> to vector<1x128xf32>
    %535 = vector.broadcast %533 : vector<8x1xf32> to vector<8x128xf32>
    %536 = vector.broadcast %534 : vector<1x128xf32> to vector<8x128xf32>
    %537 = arith.mulf %535, %536 : vector<8x128xf32>
    %538 = arith.addf %532, %537 : vector<8x128xf32>
    %539 = vector.extract_strided_slice %0 {offsets = [0, 4], sizes = [8, 1], strides = [1, 1]} : vector<8x8xf32> to vector<8x1xf32>
    %540 = vector.extract_strided_slice %515 {offsets = [4, 0], sizes = [1, 128], strides = [1, 1]} : vector<8x128xf32> to vector<1x128xf32>
    %541 = vector.broadcast %539 : vector<8x1xf32> to vector<8x128xf32>
    %542 = vector.broadcast %540 : vector<1x128xf32> to vector<8x128xf32>
    %543 = arith.mulf %541, %542 : vector<8x128xf32>
    %544 = arith.addf %538, %543 : vector<8x128xf32>
    %545 = vector.extract_strided_slice %0 {offsets = [0, 5], sizes = [8, 1], strides = [1, 1]} : vector<8x8xf32> to vector<8x1xf32>
    %546 = vector.extract_strided_slice %515 {offsets = [5, 0], sizes = [1, 128], strides = [1, 1]} : vector<8x128xf32> to vector<1x128xf32>
    %547 = vector.broadcast %545 : vector<8x1xf32> to vector<8x128xf32>
    %548 = vector.broadcast %546 : vector<1x128xf32> to vector<8x128xf32>
    %549 = arith.mulf %547, %548 : vector<8x128xf32>
    %550 = arith.addf %544, %549 : vector<8x128xf32>
    %551 = vector.extract_strided_slice %0 {offsets = [0, 6], sizes = [8, 1], strides = [1, 1]} : vector<8x8xf32> to vector<8x1xf32>
    %552 = vector.extract_strided_slice %515 {offsets = [6, 0], sizes = [1, 128], strides = [1, 1]} : vector<8x128xf32> to vector<1x128xf32>
    %553 = vector.broadcast %551 : vector<8x1xf32> to vector<8x128xf32>
    %554 = vector.broadcast %552 : vector<1x128xf32> to vector<8x128xf32>
    %555 = arith.mulf %553, %554 : vector<8x128xf32>
    %556 = arith.addf %550, %555 : vector<8x128xf32>
    %557 = vector.extract_strided_slice %0 {offsets = [0, 7], sizes = [8, 1], strides = [1, 1]} : vector<8x8xf32> to vector<8x1xf32>
    %558 = vector.extract_strided_slice %515 {offsets = [7, 0], sizes = [1, 128], strides = [1, 1]} : vector<8x128xf32> to vector<1x128xf32>
    %559 = vector.broadcast %557 : vector<8x1xf32> to vector<8x128xf32>
    %560 = vector.broadcast %558 : vector<1x128xf32> to vector<8x128xf32>
    %561 = arith.mulf %559, %560 : vector<8x128xf32>
    %562 = arith.addf %556, %561 : vector<8x128xf32>
    %563 = vector.broadcast %512 : vector<1x128xf32> to vector<8x128xf32>
    %564 = arith.addf %504, %563 : vector<8x128xf32>
    %565 = vector.broadcast %1 : vector<8x1xf32> to vector<8x128xf32>
    %566 = arith.addf %564, %565 : vector<8x128xf32>
    %567 = math.log %562 : vector<8x128xf32>
    %568 = arith.addf %566, %567 : vector<8x128xf32>
    %569 = vector.shape_cast %509 : vector<1x128xi1> to vector<1x128xi1>
    %570 = vector.broadcast %569 : vector<1x128xi1> to vector<8x128xi1>
    %571 = arith.select %570, %568, %510 : vector<8x128xi1>, vector<8x128xf32>
    %c0_82 = arith.constant 0 : index
    %c0_83 = arith.constant 0 : index
    %572 = vector.load %arg8[%c0_82, %c0_83] : memref<8x128xf32, #tpu.memory_space<vmem>>, vector<8x128xf32>
    tpu.vector_store %arg8[%c0_82, %c0_83], %571 {strides = array<i32>} : memref<8x128xf32, #tpu.memory_space<vmem>>, vector<8x128xf32>,
    %c8_i32 = arith.constant 8 : i32
    %c0_i32_84 = arith.constant 0 : i32
    %573 = arith.cmpi eq, %arg1, %c0_i32_84 : i32
    %574 = arith.extui %573 : i1 to i32
    %c0_i32_85 = arith.constant 0 : i32
    %575 = arith.cmpi ne, %574, %c0_i32_85 : i32
    scf.if %575 {
      %c0_86 = arith.constant 0 : index
      %c0_87 = arith.constant 0 : index
      %576 = vector.load %arg8[%c0_86, %c0_87] : memref<8x128xf32, #tpu.memory_space<vmem>>, vector<8x128xf32>
      %c0_88 = arith.constant 0 : index
      %c0_89 = arith.constant 0 : index
      %577 = vector.load %arg6[%c0_88, %c0_89] : memref<8x1xf32, #tpu.memory_space<vmem>>, vector<8x1xf32>
      %578 = vector.broadcast %577 : vector<8x1xf32> to vector<8x128xf32>
      %579 = arith.addf %576, %578 : vector<8x128xf32>
      %cst_90 = arith.constant dense<0xFF800000> : vector<128xf32>
      %580 = vector.multi_reduction <maximumf>, %579, %cst_90 [0] : vector<8x128xf32> to vector<128xf32>
      %581 = vector.shape_cast %580 : vector<128xf32> to vector<1x128xf32>
      %582 = vector.broadcast %581 : vector<1x128xf32> to vector<8x128xf32>
      %583 = arith.subf %579, %582 : vector<8x128xf32>
      %584 = math.exp %583 : vector<8x128xf32>
      %cst_91 = arith.constant dense<0.000000e+00> : vector<128xf32>
      %585 = vector.multi_reduction <add>, %584, %cst_91 [0] : vector<8x128xf32> to vector<128xf32>
      %586 = vector.shape_cast %585 : vector<128xf32> to vector<1x128xf32>
      %587 = math.log %586 : vector<1x128xf32>
      %588 = arith.addf %581, %587 : vector<1x128xf32>
      %c0_92 = arith.constant 0 : index
      %c0_93 = arith.constant 0 : index
      %589 = vector.load %arg7[%c0_92, %c0_93] : memref<1x128xf32, #tpu.memory_space<vmem>>, vector<1x128xf32>
      tpu.vector_store %arg7[%c0_92, %c0_93], %588 {strides = array<i32>} : memref<1x128xf32, #tpu.memory_space<vmem>>, vector<1x128xf32>,
    } else {
    }
    return
  }
  func.func @transform_0(%arg0: i32, %arg1: i32) -> (i32, i32, i32) {
    %c0_i32 = arith.constant 0 : i32
    %c0_i32_0 = arith.constant 0 : i32
    return %arg1, %c0_i32, %arg0 : i32, i32, i32
  }
  func.func @transform_1(%arg0: i32, %arg1: i32) -> (i32, i32, i32) {
    %c0_i32 = arith.constant 0 : i32
    %c0_i32_0 = arith.constant 0 : i32
    return %arg1, %c0_i32, %arg0 : i32, i32, i32
  }
  func.func @transform_2(%arg0: i32, %arg1: i32) -> (i32, i32) {
    %c0_i32 = arith.constant 0 : i32
    %c0_i32_0 = arith.constant 0 : i32
    %c0_i32_1 = arith.constant 0 : i32
    return %c0_i32, %c0_i32_0 : i32, i32
  }
  func.func @transform_3(%arg0: i32, %arg1: i32) -> (i32, i32) {
    %c0_i32 = arith.constant 0 : i32
    %c0_i32_0 = arith.constant 0 : i32
    %c0_i32_1 = arith.constant 0 : i32
    return %c0_i32, %c0_i32_0 : i32, i32
  }
  func.func @transform_4(%arg0: i32, %arg1: i32) -> (i32, i32) {
    %c0_i32 = arith.constant 0 : i32
    %c0_i32_0 = arith.constant 0 : i32
    %c0_i32_1 = arith.constant 0 : i32
    return %c0_i32, %c0_i32_0 : i32, i32
  }
  func.func @transform_5(%arg0: i32, %arg1: i32) -> (i32, i32) {
    %c0_i32 = arith.constant 0 : i32
    %c0_i32_0 = arith.constant 0 : i32
    return %c0_i32, %arg0 : i32, i32
  }
}

</mosaic_0001>

<bundles_post_ra>
// kernel: tpu_custom_call.1
= control target key start
LH: loop header
LB: loop body
LE: loop exit
PB: predicated region body
PF: predicated region fallthrough
CT: control target
= control target key end

     0   :  { %10 = vsyncpa [#allocation4], 0  ;;  %s811_s0 = inlined_call_operand.hbm [shape: f32[8,8,128], index: 0, kind: input, shape index: {}]   ;;  %s812_s1 = inlined_call_operand.vmem [shape: f32[8,1,128], index: 1, kind: input, shape index: {}]   ;;  %s813_s2 = inlined_call_operand.vmem [shape: f32[8,8], index: 2, kind: input, shape index: {}]   ;;  %s814_s3 = inlined_call_operand.vmem [shape: f32[8,1], index: 3, kind: input, shape index: {}]   ;;  %s815_s4 = inlined_call_operand.vmem [shape: f32[8,1], index: 4, kind: input, shape index: {}]   ;;  %s816_s5 = inlined_call_operand.hbm [shape: f32[1,128], index: 5, kind: output, shape index: {}]  }
   0x1   :  { %11 = vsyncpa [#allocation5], 0  ;;  %s16_s20 = sshll.u32 %s811_s0, 4  ;;  %s629_s21 = smov [#allocation3]   ;;  %s17_s20 = int_to_ptr.hbm [resolvable:$true] %s16_s20 }
   0x2   :  { %s18_s22 = sshll.u32 %s629_s21, 4  ;;  %s630_s23 = smov 128   ;;  %s19_s22 = int_to_ptr.vmem [resolvable:$true] %s18_s22 }
   0x3   :  { %s631_s24 = smov 8  }
   0x4   :  { %24 = dma.hbm_to_vmem [thread:$0]  %s17_s20, 1024, %s19_s22, [#allocation4], %s630_s23, %s630_s23, %s631_s24  }
   0x5   :  { %625 = dma.done.wait [#allocation4], 1024  }
   0x6   :  { %626 = vsyncadd [#allocation4], 4294966272  ;;  %v632_v0 = vmov 0   ;;  %v633_v1 = vmov 2   ;;  %v634_v2 = vmov 4   ;;  %v37_v3 = vld [vmem:[%s813_s2] sm:$0xff] }
   0x7   :  { %531 = vset.pattern.permute.xlu0 %v632_v0  ;;  %533 = vset.pattern.permute.xlu1 %v633_v1  ;;  %v635_v4 = vmov 1   ;;  %v636_v5 = vmov 3   ;;  %v637_v6 = vmov 5   ;;  %v38_v7 = vld [vmem:[%s814_s3] sm:$0xff]  ;;  %v638_v8 = vmov 6   ;;  %s502_s21 = sshll.u32 %s816_s5, 4  ;;  %s503_s21 = int_to_ptr.hbm [resolvable:$true] %s502_s21 }
   0x8   :  { %535 = vset.pattern.permute.xlu2 %v634_v2  ;;  %60 = vperm.xlu0 %531, %v37_v3   ;;  %v639_v9 = vmov 7   ;;  %v43_v10 = vld [vmem:[#allocation3] sm:$0xff] }
   0x9   :  { %73 = vperm.xlu1 %533, %v37_v3   ;;  %87 = vperm.xlu2 %535, %v37_v3   ;;  %v49_v11 = vrot.slane %v43_v10, 4  ;;  %v46_v49 = vld [vmem:[%s812_s1] sm:$0x1] }
   0xa   :  { %vm47_vm0 = vcmp.gt.f32.partialorder %v46_v49, 0.5 }
   0xb   :  { %v50_v12 = vmax.f32 %v43_v10, %v49_v11  ;;  %v124_v53 = vsel %vm47_vm0, 1, %v632_v0 }
   0xc   :  { %v125_v55 = vperm.slane %v124_v53, 0 }
   0xd   :  { %v51_v13 = vrot.slane %v50_v12, 2 }
   0xe   :  { %vm126_vm1 = vcmp.eq.s32.totalorder %v125_v55, 1 }
   0xf   :  { %v52_v14 = vmax.f32 %v50_v12, %v51_v13 }
  0x10   :  { %532 = vset.pattern.permute.xlu0 %v635_v4 }
  0x11   :  { %534 = vset.pattern.permute.xlu1 %v636_v5  ;;  %66 = vperm.xlu0 %532, %v37_v3   ;;  %v53_v15 = vrot.slane %v52_v14, 1 }
  0x12   :  { %80 = vperm.xlu1 %534, %v37_v3   ;;  %536 = vset.pattern.permute.xlu2 %v637_v6 }
  0x13   :  { %94 = vperm.xlu2 %536, %v37_v3   ;;  %v54_v16 = vmax.f32 %v52_v14, %v53_v15 }
  0x15   :  { %v55_v17 = vsub.f32 %v43_v10, %v54_v16  ;;  %v114_v52 = vadd.f32 %v54_v16, %v43_v10 }
  0x17   :  { %v56_v18 = vmul.f32 1.442695, %v55_v17 }
  0x19   :  { %539 = vset.pattern.permute.xlu0 %v632_v0  ;;  %541 = vpow2.f32 %v56_v18 }
  0x1a   :  { %537 = vset.pattern.permute.xlu1 %v638_v8  ;;  %117 = vperm.xlu0 %539, %v38_v7  }
  0x1b   :  { %101 = vperm.xlu1 %537, %v37_v3   ;;  %538 = vset.pattern.permute.xlu2 %v639_v9 }
  0x1c   :  { %108 = vperm.xlu2 %538, %v37_v3  }
  0x1f   :  { %v542_v22 = vpop.eup %541 }
  0x20   :  { %v63_v23 = vperm.slane %v542_v22, 0  ;;  %v69_v24 = vperm.slane %v542_v22, 1  ;;  %v76_v26 = vperm.slane %v542_v22, 2  ;;  %v83_v31 = vperm.slane %v542_v22, 3 }
  0x21   :  { %v90_v33 = vperm.slane %v542_v22, 4  ;;  %v97_v37 = vperm.slane %v542_v22, 5  ;;  %v104_v38 = vperm.slane %v542_v22, 6  ;;  %v111_v41 = vperm.slane %v542_v22, 7 }
  0x23   :  { %540 = vset.pattern.permute.xlu1 %v632_v0 }
  0x63   :  { %v683_v19 = vpop.permute.xlu2 %87 }
  0x64   :  { %v91_v39 = vmul.f32 %v90_v33, %v683_v19  ;;  %v512_v33 = vld [vmem:[%s812_s1 + $0x1] sm:$0x1] }
  0x65   :  { %vm133_vm2 = vcmp.gt.f32.partialorder %v512_v33, 0.5 }
  0x6d   :  { %v689_v25 = vpop.permute.xlu2 %94 }
  0x6e   :  { %v98_v43 = vmul.f32 %v97_v37, %v689_v25  ;;  %v130_v37 = vld [vmem:[#allocation3 + $0x8] sm:$0xff] }
  0x76   :  { %v700_v42 = vpop.permute.xlu2 %108 }
  0x77   :  { %v112_v48 = vmul.f32 %v111_v41, %v700_v42 }
  0x7a   :  { %v685_v20 = vpop.permute.xlu0 %60 }
  0x7b   :  { %v687_v21 = vpop.permute.xlu1 %73  ;;  %v64_v29 = vmul.f32 %v63_v23, %v685_v20 }
  0x7c   :  { %v77_v32 = vmul.f32 %v76_v26, %v687_v21 }
  0x83   :  { %v691_v27 = vpop.permute.xlu0 %66 }
  0x84   :  { %v693_v28 = vpop.permute.xlu1 %80  ;;  %v70_v30 = vmul.f32 %v69_v24, %v691_v27 }
  0x85   :  { %v84_v36 = vmul.f32 %v83_v31, %v693_v28 }
  0x86   :  { %v71_v34 = vadd.f32 %v70_v30, %v64_v29 }
  0x88   :  { %v78_v35 = vadd.f32 %v77_v32, %v71_v34 }
  0x8a   :  { %v85_v40 = vadd.f32 %v84_v36, %v78_v35 }
  0x8c   :  { %v92_v45 = vadd.f32 %v91_v39, %v85_v40  ;;  %v711_v54 = vpop.permute.xlu0 %117 }
  0x8d   :  { %v703_v44 = vpop.permute.xlu1 %101  ;;  %v120_v56 = vadd.f32 %v711_v54, %v114_v52 }
  0x8e   :  { %v105_v46 = vmul.f32 %v104_v38, %v703_v44  ;;  %v99_v47 = vadd.f32 %v98_v43, %v92_v45  ;;  %v172_v38 = vsel %vm133_vm2, 1, %v632_v0 }
  0x8f   :  { %v173_v40 = vperm.slane %v172_v38, 0 }
  0x90   :  { %v106_v50 = vadd.f32 %v105_v46, %v99_v47 }
  0x91   :  { %vm174_vm3 = vcmp.eq.s32.totalorder %v173_v40, 1 }
  0x92   :  { %v113_v51 = vadd.f32 %v112_v48, %v106_v50 }
  0x94   :  { %543 = vlog2.f32 %v113_v51 }
  0x9a   :  { %v544_v57 = vpop.eup %543 }
  0x9b   :  { %v122_v58 = vmul.f32 0.6931472, %v544_v57 }
  0x9d   :  { %v123_v59 = vadd.f32 %v122_v58, %v120_v56 }
  0x9f   :  { %v127_v60 = vsel %vm126_vm1, %v123_v59, %v43_v10 }
  0xa0   :  { %v135_v61 = vrot.slane %v127_v60, 4 }
  0xa2   :  { %v136_v62 = vmax.f32 %v127_v60, %v135_v61 }
  0xa4   :  { %v137_v63 = vrot.slane %v136_v62, 2 }
  0xa6   :  { %v138_v1 = vmax.f32 %v136_v62, %v137_v63 }
  0xa8   :  { %v139_v2 = vrot.slane %v138_v1, 1 }
  0xaa   :  { %v140_v3 = vmax.f32 %v138_v1, %v139_v2 }
  0xac   :  { %v141_v4 = vsub.f32 %v127_v60, %v140_v3  ;;  %v167_v39 = vadd.f32 %v140_v3, %v130_v37 }
  0xae   :  { %v142_v5 = vmul.f32 1.442695, %v141_v4  ;;  %v168_v43 = vadd.f32 %v167_v39, %v711_v54 }
  0xb0   :  { %545 = vpow2.f32 %v142_v5 }
  0xb6   :  { %v546_v6 = vpop.eup %545 }
  0xb7   :  { %v144_v7 = vperm.slane %v546_v6, 0  ;;  %v146_v8 = vperm.slane %v546_v6, 1  ;;  %v149_v9 = vperm.slane %v546_v6, 2  ;;  %v152_v13 = vperm.slane %v546_v6, 3 }
  0xb8   :  { %v155_v15 = vperm.slane %v546_v6, 4  ;;  %v158_v18 = vperm.slane %v546_v6, 5  ;;  %v161_v24 = vperm.slane %v546_v6, 6  ;;  %v164_v30 = vperm.slane %v546_v6, 7 }
  0xb9   :  { %v145_v11 = vmul.f32 %v144_v7, %v685_v20  ;;  %v147_v12 = vmul.f32 %v146_v8, %v691_v27  ;;  %v150_v10 = vmul.f32 %v149_v9, %v687_v21  ;;  %v153_v17 = vmul.f32 %v152_v13, %v693_v28 }
  0xba   :  { %v156_v23 = vmul.f32 %v155_v15, %v683_v19  ;;  %v159_v29 = vmul.f32 %v158_v18, %v689_v25  ;;  %v162_v32 = vmul.f32 %v161_v24, %v703_v44  ;;  %v165_v35 = vmul.f32 %v164_v30, %v700_v42  ;;  %v513_v15 = vld [vmem:[%s812_s1 + $0x2] sm:$0x1] }
  0xbb   :  { %v148_v14 = vadd.f32 %v147_v12, %v145_v11  ;;  %vm181_vm4 = vcmp.gt.f32.partialorder %v513_v15, 0.5 }
  0xbd   :  { %v151_v16 = vadd.f32 %v150_v10, %v148_v14 }
  0xbf   :  { %v154_v22 = vadd.f32 %v153_v17, %v151_v16 }
  0xc1   :  { %v157_v26 = vadd.f32 %v156_v23, %v154_v22  ;;  %v178_v22 = vld [vmem:[#allocation3 + $0x10] sm:$0xff]  ;;  %v220_v23 = vsel %vm181_vm4, 1, %v632_v0 }
  0xc3   :  { %v160_v31 = vadd.f32 %v159_v29, %v157_v26  ;;  %v221_v26 = vperm.slane %v220_v23, 0 }
  0xc5   :  { %v163_v34 = vadd.f32 %v162_v32, %v160_v31  ;;  %vm222_vm5 = vcmp.eq.s32.totalorder %v221_v26, 1 }
  0xc7   :  { %v166_v36 = vadd.f32 %v165_v35, %v163_v34 }
  0xc9   :  { %547 = vlog2.f32 %v166_v36 }
  0xcf   :  { %v548_v41 = vpop.eup %547 }
  0xd0   :  { %v170_v45 = vmul.f32 0.6931472, %v548_v41 }
  0xd2   :  { %v171_v46 = vadd.f32 %v170_v45, %v168_v43 }
  0xd4   :  { %v175_v47 = vsel %vm174_vm3, %v171_v46, %v127_v60 }
  0xd5   :  { %v183_v48 = vrot.slane %v175_v47, 4 }
  0xd7   :  { %v184_v49 = vmax.f32 %v175_v47, %v183_v48 }
  0xd9   :  { %v185_v50 = vrot.slane %v184_v49, 2 }
  0xdb   :  { %v186_v51 = vmax.f32 %v184_v49, %v185_v50 }
  0xdd   :  { %v187_v52 = vrot.slane %v186_v51, 1 }
  0xdf   :  { %v188_v53 = vmax.f32 %v186_v51, %v187_v52 }
  0xe1   :  { %v189_v55 = vsub.f32 %v175_v47, %v188_v53  ;;  %v215_v24 = vadd.f32 %v188_v53, %v178_v22 }
  0xe3   :  { %v190_v56 = vmul.f32 1.442695, %v189_v55  ;;  %v216_v30 = vadd.f32 %v215_v24, %v711_v54 }
  0xe5   :  { %549 = vpow2.f32 %v190_v56 }
  0xeb   :  { %v550_v57 = vpop.eup %549 }
  0xec   :  { %v192_v58 = vperm.slane %v550_v57, 0  ;;  %v194_v59 = vperm.slane %v550_v57, 1  ;;  %v197_v61 = vperm.slane %v550_v57, 2  ;;  %v200_v1 = vperm.slane %v550_v57, 3 }
  0xed   :  { %v203_v3 = vperm.slane %v550_v57, 4  ;;  %v206_v6 = vperm.slane %v550_v57, 5  ;;  %v209_v9 = vperm.slane %v550_v57, 6  ;;  %v212_v13 = vperm.slane %v550_v57, 7 }
  0xee   :  { %v193_v62 = vmul.f32 %v192_v58, %v685_v20  ;;  %v195_v63 = vmul.f32 %v194_v59, %v691_v27  ;;  %v198_v60 = vmul.f32 %v197_v61, %v687_v21  ;;  %v201_v5 = vmul.f32 %v200_v1, %v693_v28 }
  0xef   :  { %v204_v8 = vmul.f32 %v203_v3, %v683_v19  ;;  %v207_v12 = vmul.f32 %v206_v6, %v689_v25  ;;  %v210_v10 = vmul.f32 %v209_v9, %v703_v44  ;;  %v213_v17 = vmul.f32 %v212_v13, %v700_v42  ;;  %v514_v3 = vld [vmem:[%s812_s1 + $0x3] sm:$0x1] }
  0xf0   :  { %v196_v2 = vadd.f32 %v195_v63, %v193_v62  ;;  %vm229_vm6 = vcmp.gt.f32.partialorder %v514_v3, 0.5 }
  0xf2   :  { %v199_v4 = vadd.f32 %v198_v60, %v196_v2 }
  0xf4   :  { %v202_v7 = vadd.f32 %v201_v5, %v199_v4 }
  0xf6   :  { %v205_v11 = vadd.f32 %v204_v8, %v202_v7  ;;  %v226_v7 = vld [vmem:[#allocation3 + $0x18] sm:$0xff]  ;;  %v268_v8 = vsel %vm229_vm6, 1, %v632_v0 }
  0xf8   :  { %v208_v14 = vadd.f32 %v207_v12, %v205_v11  ;;  %v269_v11 = vperm.slane %v268_v8, 0 }
  0xfa   :  { %v211_v16 = vadd.f32 %v210_v10, %v208_v14  ;;  %vm270_vm7 = vcmp.eq.s32.totalorder %v269_v11, 1 }
  0xfc   :  { %v214_v18 = vadd.f32 %v213_v17, %v211_v16 }
  0xfe   :  { %551 = vlog2.f32 %v214_v18 }
 0x104   :  { %v552_v29 = vpop.eup %551 }
 0x105   :  { %v218_v31 = vmul.f32 0.6931472, %v552_v29 }
 0x107   :  { %v219_v32 = vadd.f32 %v218_v31, %v216_v30  ;;  %v469_v30 = vld [vmem:[%s815_s4] sm:$0xff] }
 0x108   :  { %472 = vperm.xlu1 %540, %v469_v30  }
 0x109   :  { %v223_v33 = vsel %vm222_vm5, %v219_v32, %v175_v47 }
 0x10a   :  { %v231_v34 = vrot.slane %v223_v33, 4 }
 0x10c   :  { %v232_v35 = vmax.f32 %v223_v33, %v231_v34 }
 0x10e   :  { %v233_v36 = vrot.slane %v232_v35, 2 }
 0x110   :  { %v234_v37 = vmax.f32 %v232_v35, %v233_v36 }
 0x112   :  { %v235_v38 = vrot.slane %v234_v37, 1 }
 0x114   :  { %v236_v39 = vmax.f32 %v234_v37, %v235_v38 }
 0x116   :  { %v237_v40 = vsub.f32 %v223_v33, %v236_v39  ;;  %v263_v9 = vadd.f32 %v236_v39, %v226_v7 }
 0x118   :  { %v238_v41 = vmul.f32 1.442695, %v237_v40  ;;  %v264_v13 = vadd.f32 %v263_v9, %v711_v54 }
 0x11a   :  { %553 = vpow2.f32 %v238_v41 }
 0x120   :  { %v554_v43 = vpop.eup %553 }
 0x121   :  { %v240_v45 = vperm.slane %v554_v43, 0  ;;  %v242_v46 = vperm.slane %v554_v43, 1  ;;  %v245_v48 = vperm.slane %v554_v43, 2  ;;  %v248_v51 = vperm.slane %v554_v43, 3 }
 0x122   :  { %v251_v53 = vperm.slane %v554_v43, 4  ;;  %v254_v57 = vperm.slane %v554_v43, 5  ;;  %v257_v61 = vperm.slane %v554_v43, 6  ;;  %v260_v1 = vperm.slane %v554_v43, 7 }
 0x123   :  { %v241_v49 = vmul.f32 %v240_v45, %v685_v20  ;;  %v243_v50 = vmul.f32 %v242_v46, %v691_v27  ;;  %v246_v47 = vmul.f32 %v245_v48, %v687_v21  ;;  %v249_v56 = vmul.f32 %v248_v51, %v693_v28 }
 0x124   :  { %v252_v59 = vmul.f32 %v251_v53, %v683_v19  ;;  %v255_v63 = vmul.f32 %v254_v57, %v689_v25  ;;  %v258_v60 = vmul.f32 %v257_v61, %v703_v44  ;;  %v261_v5 = vmul.f32 %v260_v1, %v700_v42 }
 0x125   :  { %v244_v52 = vadd.f32 %v243_v50, %v241_v49 }
 0x127   :  { %v247_v55 = vadd.f32 %v246_v47, %v244_v52 }
 0x129   :  { %v250_v58 = vadd.f32 %v249_v56, %v247_v55  ;;  %v515_v55 = vld [vmem:[%s812_s1 + $0x4] sm:$0x1] }
 0x12a   :  { %vm277_vm8 = vcmp.gt.f32.partialorder %v515_v55, 0.5 }
 0x12b   :  { %v253_v62 = vadd.f32 %v252_v59, %v250_v58  ;;  %v274_v59 = vld [vmem:[#allocation3 + $0x20] sm:$0xff]  ;;  %v316_v61 = vsel %vm277_vm8, 1, %v632_v0 }
 0x12d   :  { %v256_v2 = vadd.f32 %v255_v63, %v253_v62  ;;  %v317_v63 = vperm.slane %v316_v61, 0 }
 0x12f   :  { %v259_v4 = vadd.f32 %v258_v60, %v256_v2  ;;  %vm318_vm9 = vcmp.eq.s32.totalorder %v317_v63, 1 }
 0x131   :  { %v262_v6 = vadd.f32 %v261_v5, %v259_v4 }
 0x133   :  { %555 = vlog2.f32 %v262_v6 }
 0x139   :  { %v556_v12 = vpop.eup %555 }
 0x13a   :  { %v266_v14 = vmul.f32 0.6931472, %v556_v12 }
 0x13c   :  { %v267_v10 = vadd.f32 %v266_v14, %v264_v13 }
 0x13e   :  { %v271_v15 = vsel %vm270_vm7, %v267_v10, %v223_v33 }
 0x13f   :  { %v279_v16 = vrot.slane %v271_v15, 4 }
 0x141   :  { %v280_v17 = vmax.f32 %v271_v15, %v279_v16 }
 0x143   :  { %v281_v18 = vrot.slane %v280_v17, 2 }
 0x145   :  { %v282_v22 = vmax.f32 %v280_v17, %v281_v18 }
 0x147   :  { %v283_v23 = vrot.slane %v282_v22, 1 }
 0x149   :  { %v284_v24 = vmax.f32 %v282_v22, %v283_v23 }
 0x14b   :  { %v285_v26 = vsub.f32 %v271_v15, %v284_v24  ;;  %v311_v62 = vadd.f32 %v284_v24, %v274_v59 }
 0x14d   :  { %v286_v29 = vmul.f32 1.442695, %v285_v26  ;;  %v312_v2 = vadd.f32 %v311_v62, %v711_v54 }
 0x14f   :  { %557 = vpow2.f32 %v286_v29 }
 0x155   :  { %v558_v31 = vpop.eup %557 }
 0x156   :  { %v288_v32 = vperm.slane %v558_v31, 0  ;;  %v290_v34 = vperm.slane %v558_v31, 1  ;;  %v293_v35 = vperm.slane %v558_v31, 2  ;;  %v296_v37 = vperm.slane %v558_v31, 3 }
 0x157   :  { %v299_v40 = vperm.slane %v558_v31, 4  ;;  %v302_v45 = vperm.slane %v558_v31, 5  ;;  %v305_v49 = vperm.slane %v558_v31, 6  ;;  %v308_v52 = vperm.slane %v558_v31, 7 }
 0x158   :  { %v289_v33 = vmul.f32 %v288_v32, %v685_v20  ;;  %v291_v36 = vmul.f32 %v290_v34, %v691_v27  ;;  %v294_v39 = vmul.f32 %v293_v35, %v687_v21  ;;  %v297_v43 = vmul.f32 %v296_v37, %v693_v28 }
 0x159   :  { %v300_v48 = vmul.f32 %v299_v40, %v683_v19  ;;  %v303_v51 = vmul.f32 %v302_v45, %v689_v25  ;;  %v306_v53 = vmul.f32 %v305_v49, %v703_v44  ;;  %v309_v57 = vmul.f32 %v308_v52, %v700_v42  ;;  %v516_v40 = vld [vmem:[%s812_s1 + $0x5] sm:$0x1] }
 0x15a   :  { %v292_v38 = vadd.f32 %v291_v36, %v289_v33  ;;  %vm325_vm10 = vcmp.gt.f32.partialorder %v516_v40, 0.5 }
 0x15c   :  { %v295_v41 = vadd.f32 %v294_v39, %v292_v38 }
 0x15e   :  { %v298_v46 = vadd.f32 %v297_v43, %v295_v41 }
 0x160   :  { %v301_v50 = vadd.f32 %v300_v48, %v298_v46  ;;  %v322_v46 = vld [vmem:[#allocation3 + $0x28] sm:$0xff]  ;;  %v364_v48 = vsel %vm325_vm10, 1, %v632_v0 }
 0x162   :  { %v304_v47 = vadd.f32 %v303_v51, %v301_v50  ;;  %v365_v50 = vperm.slane %v364_v48, 0 }
 0x164   :  { %v307_v56 = vadd.f32 %v306_v53, %v304_v47  ;;  %vm366_vm11 = vcmp.eq.s32.totalorder %v365_v50, 1 }
 0x166   :  { %v310_v58 = vadd.f32 %v309_v57, %v307_v56 }
 0x168   :  { %559 = vlog2.f32 %v310_v58 }
 0x16e   :  { %v560_v1 = vpop.eup %559 }
 0x16f   :  { %v314_v60 = vmul.f32 0.6931472, %v560_v1 }
 0x171   :  { %v315_v3 = vadd.f32 %v314_v60, %v312_v2 }
 0x173   :  { %v319_v4 = vsel %vm318_vm9, %v315_v3, %v271_v15 }
 0x174   :  { %v327_v5 = vrot.slane %v319_v4, 4 }
 0x176   :  { %v328_v6 = vmax.f32 %v319_v4, %v327_v5 }
 0x178   :  { %v329_v7 = vrot.slane %v328_v6, 2 }
 0x17a   :  { %v330_v8 = vmax.f32 %v328_v6, %v329_v7 }
 0x17c   :  { %v331_v9 = vrot.slane %v330_v8, 1 }
 0x17e   :  { %v332_v11 = vmax.f32 %v330_v8, %v331_v9 }
 0x180   :  { %v333_v12 = vsub.f32 %v319_v4, %v332_v11  ;;  %v359_v49 = vadd.f32 %v332_v11, %v322_v46 }
 0x182   :  { %v334_v13 = vmul.f32 1.442695, %v333_v12  ;;  %v360_v52 = vadd.f32 %v359_v49, %v711_v54 }
 0x184   :  { %561 = vpow2.f32 %v334_v13 }
 0x18a   :  { %v562_v14 = vpop.eup %561 }
 0x18b   :  { %v336_v10 = vperm.slane %v562_v14, 0  ;;  %v338_v16 = vperm.slane %v562_v14, 1  ;;  %v341_v17 = vperm.slane %v562_v14, 2  ;;  %v344_v23 = vperm.slane %v562_v14, 3 }
 0x18c   :  { %v347_v26 = vperm.slane %v562_v14, 4  ;;  %v350_v31 = vperm.slane %v562_v14, 5  ;;  %v353_v35 = vperm.slane %v562_v14, 6  ;;  %v356_v37 = vperm.slane %v562_v14, 7 }
 0x18d   :  { %v337_v18 = vmul.f32 %v336_v10, %v685_v20  ;;  %v339_v22 = vmul.f32 %v338_v16, %v691_v27  ;;  %v342_v15 = vmul.f32 %v341_v17, %v687_v21  ;;  %v345_v30 = vmul.f32 %v344_v23, %v693_v28 }
 0x18e   :  { %v348_v34 = vmul.f32 %v347_v26, %v683_v19  ;;  %v351_v36 = vmul.f32 %v350_v31, %v689_v25  ;;  %v354_v39 = vmul.f32 %v353_v35, %v703_v44  ;;  %v357_v43 = vmul.f32 %v356_v37, %v700_v42  ;;  %v517_v26 = vld [vmem:[%s812_s1 + $0x6] sm:$0x1] }
 0x18f   :  { %v340_v24 = vadd.f32 %v339_v22, %v337_v18  ;;  %vm373_vm12 = vcmp.gt.f32.partialorder %v517_v26, 0.5 }
 0x191   :  { %v343_v29 = vadd.f32 %v342_v15, %v340_v24 }
 0x193   :  { %v346_v32 = vadd.f32 %v345_v30, %v343_v29 }
 0x195   :  { %v349_v33 = vadd.f32 %v348_v34, %v346_v32  ;;  %v370_v32 = vld [vmem:[#allocation3 + $0x30] sm:$0xff]  ;;  %v412_v34 = vsel %vm373_vm12, 1, %v632_v0 }
 0x197   :  { %v352_v38 = vadd.f32 %v351_v36, %v349_v33  ;;  %v413_v33 = vperm.slane %v412_v34, 0 }
 0x199   :  { %v355_v41 = vadd.f32 %v354_v39, %v352_v38  ;;  %vm414_vm13 = vcmp.eq.s32.totalorder %v413_v33, 1 }
 0x19b   :  { %v358_v45 = vadd.f32 %v357_v43, %v355_v41 }
 0x19d   :  { %563 = vlog2.f32 %v358_v45 }
 0x1a3   :  { %v564_v51 = vpop.eup %563 }
 0x1a4   :  { %v362_v47 = vmul.f32 0.6931472, %v564_v51 }
 0x1a6   :  { %v363_v53 = vadd.f32 %v362_v47, %v360_v52 }
 0x1a8   :  { %v367_v55 = vsel %vm366_vm11, %v363_v53, %v319_v4 }
 0x1a9   :  { %v375_v56 = vrot.slane %v367_v55, 4 }
 0x1ab   :  { %v376_v57 = vmax.f32 %v367_v55, %v375_v56 }
 0x1ad   :  { %v377_v58 = vrot.slane %v376_v57, 2 }
 0x1af   :  { %v378_v59 = vmax.f32 %v376_v57, %v377_v58 }
 0x1b1   :  { %v379_v61 = vrot.slane %v378_v59, 1 }
 0x1b3   :  { %v380_v62 = vmax.f32 %v378_v59, %v379_v61 }
 0x1b5   :  { %v381_v63 = vsub.f32 %v367_v55, %v380_v62  ;;  %v407_v35 = vadd.f32 %v380_v62, %v370_v32 }
 0x1b7   :  { %v382_v1 = vmul.f32 1.442695, %v381_v63  ;;  %v408_v37 = vadd.f32 %v407_v35, %v711_v54 }
 0x1b9   :  { %565 = vpow2.f32 %v382_v1 }
 0x1bf   :  { %v566_v2 = vpop.eup %565 }
 0x1c0   :  { %v384_v60 = vperm.slane %v566_v2, 0  ;;  %v386_v3 = vperm.slane %v566_v2, 1  ;;  %v389_v5 = vperm.slane %v566_v2, 2  ;;  %v392_v8 = vperm.slane %v566_v2, 3 }
 0x1c1   :  { %v395_v11 = vperm.slane %v566_v2, 4  ;;  %v398_v14 = vperm.slane %v566_v2, 5  ;;  %v401_v17 = vperm.slane %v566_v2, 6  ;;  %v404_v23 = vperm.slane %v566_v2, 7 }
 0x1c2   :  { %v385_v6 = vmul.f32 %v384_v60, %v685_v20  ;;  %v387_v7 = vmul.f32 %v386_v3, %v691_v27  ;;  %v390_v4 = vmul.f32 %v389_v5, %v687_v21  ;;  %v393_v13 = vmul.f32 %v392_v8, %v693_v28 }
 0x1c3   :  { %v396_v16 = vmul.f32 %v395_v11, %v683_v19  ;;  %v399_v22 = vmul.f32 %v398_v14, %v689_v25  ;;  %v402_v15 = vmul.f32 %v401_v17, %v703_v44  ;;  %v405_v30 = vmul.f32 %v404_v23, %v700_v42  ;;  %v418_v11 = vld [vmem:[#allocation3 + $0x38] sm:$0xff] }
 0x1c4   :  { %v388_v9 = vadd.f32 %v387_v7, %v385_v6 }
 0x1c6   :  { %v391_v12 = vadd.f32 %v390_v4, %v388_v9 }
 0x1c8   :  { %v394_v10 = vadd.f32 %v393_v13, %v391_v12 }
 0x1ca   :  { %v397_v18 = vadd.f32 %v396_v16, %v394_v10 }
 0x1cc   :  { %v400_v24 = vadd.f32 %v399_v22, %v397_v18 }
 0x1ce   :  { %v403_v29 = vadd.f32 %v402_v15, %v400_v24 }
 0x1d0   :  { %v406_v31 = vadd.f32 %v405_v30, %v403_v29 }
 0x1d2   :  { %567 = vlog2.f32 %v406_v31 }
 0x1d8   :  { %v568_v36 = vpop.eup %567 }
 0x1d9   :  { %v410_v38 = vmul.f32 0.6931472, %v568_v36 }
 0x1db   :  { %v411_v39 = vadd.f32 %v410_v38, %v408_v37 }
 0x1dd   :  { %v415_v40 = vsel %vm414_vm13, %v411_v39, %v367_v55 }
 0x1de   :  { %v423_v41 = vrot.slane %v415_v40, 4 }
 0x1e0   :  { %v424_v43 = vmax.f32 %v415_v40, %v423_v41 }
 0x1e2   :  { %v425_v45 = vrot.slane %v424_v43, 2 }
 0x1e4   :  { %v426_v46 = vmax.f32 %v424_v43, %v425_v45 }
 0x1e6   :  { %v427_v48 = vrot.slane %v426_v46, 1 }
 0x1e8   :  { %v428_v49 = vmax.f32 %v426_v46, %v427_v48 }
 0x1ea   :  { %v429_v50 = vsub.f32 %v415_v40, %v428_v49  ;;  %v455_v12 = vadd.f32 %v428_v49, %v418_v11 }
 0x1ec   :  { %v430_v51 = vmul.f32 1.442695, %v429_v50  ;;  %v456_v14 = vadd.f32 %v455_v12, %v711_v54 }
 0x1ee   :  { %569 = vpow2.f32 %v430_v51 }
 0x1f4   :  { %v570_v52 = vpop.eup %569 }
 0x1f5   :  { %v432_v47 = vperm.slane %v570_v52, 0  ;;  %v434_v53 = vperm.slane %v570_v52, 1  ;;  %v437_v56 = vperm.slane %v570_v52, 2  ;;  %v440_v59 = vperm.slane %v570_v52, 3 }
 0x1f6   :  { %v443_v62 = vperm.slane %v570_v52, 4  ;;  %v446_v2 = vperm.slane %v570_v52, 5  ;;  %v449_v5 = vperm.slane %v570_v52, 6  ;;  %v452_v8 = vperm.slane %v570_v52, 7 }
 0x1f7   :  { %v433_v57 = vmul.f32 %v432_v47, %v685_v20  ;;  %v435_v58 = vmul.f32 %v434_v53, %v691_v27  ;;  %v438_v55 = vmul.f32 %v437_v56, %v687_v21  ;;  %v441_v1 = vmul.f32 %v440_v59, %v693_v28  ;;  %v518_v21 = vld [vmem:[%s812_s1 + $0x7] sm:$0x1]  ;;  %s640_s1 = smov [#allocation6]  }
 0x1f8   :  { %v444_v3 = vmul.f32 %v443_v62, %v683_v19  ;;  %v447_v7 = vmul.f32 %v446_v2, %v689_v25  ;;  %v450_v27 = vmul.f32 %v449_v5, %v703_v44  ;;  %v453_v4 = vmul.f32 %v452_v8, %v700_v42  ;;  %v473_v44 = vpop.permute.xlu1 %472  ;;  %s500_s18 = sshll.u32 %s640_s1, 4  ;;  %s501_s18 = int_to_ptr.vmem [resolvable:$true] %s500_s18 }
 0x1f9   :  { %v436_v61 = vadd.f32 %v435_v58, %v433_v57  ;;  %vm421_vm14 = vcmp.gt.f32.partialorder %v518_v21, 0.5 }
 0x1fa   :  { %v460_v19 = vsel %vm421_vm14, 1, %v632_v0 }
 0x1fb   :  { %v439_v63 = vadd.f32 %v438_v55, %v436_v61  ;;  %v461_v13 = vperm.slane %v460_v19, 0 }
 0x1fd   :  { %v442_v60 = vadd.f32 %v441_v1, %v439_v63  ;;  %vm462_vm15 = vcmp.eq.s32.totalorder %v461_v13, 1 }
 0x1ff   :  { %v445_v6 = vadd.f32 %v444_v3, %v442_v60 }
 0x201   :  { %v448_v20 = vadd.f32 %v447_v7, %v445_v6 }
 0x203   :  { %v451_v9 = vadd.f32 %v450_v27, %v448_v20 }
 0x205   :  { %v454_v28 = vadd.f32 %v453_v4, %v451_v9 }
 0x207   :  { %571 = vlog2.f32 %v454_v28 }
 0x20d   :  { %v572_v25 = vpop.eup %571 }
 0x20e   :  { %v458_v10 = vmul.f32 0.6931472, %v572_v25 }
 0x210   :  { %v459_v16 = vadd.f32 %v458_v10, %v456_v14 }
 0x212   :  { %v463_v17 = vsel %vm462_vm15, %v459_v16, %v415_v40 }
 0x213   :  { %v475_v18 = vadd.f32 %v473_v44, %v463_v17 }
 0x215   :  { %v476_v22 = vrot.slane %v475_v18, 4 }
 0x217   :  { %v477_v23 = vmax.f32 %v475_v18, %v476_v22 }
 0x219   :  { %v478_v42 = vrot.slane %v477_v23, 2 }
 0x21b   :  { %v479_v24 = vmax.f32 %v477_v23, %v478_v42 }
 0x21d   :  { %v480_v15 = vrot.slane %v479_v24, 1 }
 0x21f   :  { %v481_v26 = vmax.f32 %v479_v24, %v480_v15 }
 0x221   :  { %v482_v29 = vsub.f32 %v475_v18, %v481_v26 }
 0x223   :  { %v483_v30 = vmul.f32 1.442695, %v482_v29 }
 0x225   :  { %573 = vpow2.f32 %v483_v30 }
 0x22b   :  { %v574_v0 = vpop.eup %573 }
 0x22c   :  { %v485_v31 = vrot.slane %v574_v0, 4 }
 0x22e   :  { %v486_v32 = vadd.f32 %v574_v0, %v485_v31 }
 0x230   :  { %v487_v34 = vrot.slane %v486_v32, 2 }
 0x232   :  { %v488_v54 = vadd.f32 %v487_v34, %v486_v32 }
 0x234   :  { %v489_v35 = vrot.slane %v488_v54, 1 }
 0x236   :  { %v490_v33 = vadd.f32 %v489_v35, %v488_v54 }
 0x238   :  { %575 = vlog2.f32 %v490_v33 }
 0x23e   :  { %v576_v36 = vpop.eup %575 }
 0x23f   :  { %v492_v37 = vmul.f32 0.6931472, %v576_v36 }
 0x241   :  { %v493_v38 = vadd.f32 %v492_v37, %v481_v26 }
 0x243   :  { %494 = vst [vmem:[#allocation6] sm:$0x1] %v493_v38 }
 0x244   :  { %505 = dma.vmem_to_hbm [thread:$0]  %s501_s18, 16, %s503_s21, [#allocation5]  }
 0x245   :  { %627 = dma.done.wait [#allocation5], 16  }
 0x246   :  { %628 = vsyncadd [#allocation5], 4294967280 }
 0x247   :  { %510 = vsyncpa [#allocation4], 1 }
 0x248   :  { %511 = vsyncpa [#allocation5], 1 }

</bundles_post_ra>
